<compile_context>
chip_gen: v6e
topology: v6e:2x2x1
jax: 0.10.0
libtpu: 0.0.40
codegen_flags: <defaults>
</compile_context>

<pallas_src>
import functools

import jax
import jax.numpy as jnp
from jax import lax
from jax.experimental import pallas as pl
from jax.experimental.pallas import tpu as pltpu


# ----------------------------------------------------------------------------
# In-kernel helpers
# ----------------------------------------------------------------------------
def _layernorm(x, gamma, beta, eps=1e-5):
    # x: (N, D) f32 ; gamma/beta: (1, D)
    mean = jnp.mean(x, axis=-1, keepdims=True)
    var = jnp.mean((x - mean) ** 2, axis=-1, keepdims=True)
    return (x - mean) * lax.rsqrt(var + eps) * gamma + beta


# ----------------------------------------------------------------------------
# Fused per-(batch, layer) kernel.  x carried in VMEM scratch across layers.
# ----------------------------------------------------------------------------
def transformer_layer_kernel(
        x_ref,
        ln1_g_ref, ln1_b_ref, wqkv_ref, wout_ref, bout_ref,
        ln2_g_ref, ln2_b_ref, w1_ref, b1_ref, w2_ref, b2_ref,
        o_ref, x_scr, *, heads, dim_head):
    d = pl.program_id(1)  # layer index (inner, sequential)

    @pl.when(d == 0)
    def _():
        # Load this batch element's residual stream into the f32 VMEM carry.
        x_scr[...] = x_ref[0].astype(jnp.float32)

    x = x_scr[...]                       # (N, DIM) f32
    n, dim = x.shape
    inner = heads * dim_head

    # ---------------- Attention: Residual(PreNorm(Attention)) ----------------
    xn = _layernorm(x,
                    ln1_g_ref[0].astype(jnp.float32),
                    ln1_b_ref[0].astype(jnp.float32))

    wqkv = wqkv_ref[0]                   # (DIM, 3*inner); scale folded into Q cols
    wout = wout_ref[0]                   # (inner, DIM)
    contract_last = (((1,), (1,)), ((), ()))   # q @ k^T without explicit transpose

    attn_out = jnp.zeros((n, dim), jnp.float32)
    for h in range(heads):               # static unroll; weight-column slices only
        c = h * dim_head
        q = jnp.dot(xn, wqkv[:, c:c + dim_head],
                    preferred_element_type=jnp.float32)                     # (N, Dh)
        k = jnp.dot(xn, wqkv[:, inner + c:inner + c + dim_head],
                    preferred_element_type=jnp.float32)                     # (N, Dh)
        v = jnp.dot(xn, wqkv[:, 2 * inner + c:2 * inner + c + dim_head],
                    preferred_element_type=jnp.float32)                     # (N, Dh)

        dots = lax.dot_general(q, k, contract_last,
                               preferred_element_type=jnp.float32)          # (N, N)
        dots = dots - jnp.max(dots, axis=-1, keepdims=True)
        e = jnp.exp(dots)
        p = e * pl.reciprocal(jnp.sum(e, axis=-1, keepdims=True), approx=True)

        oh = jnp.dot(p, v, preferred_element_type=jnp.float32)              # (N, Dh)
        # concat-over-heads @ W_out  ==  sum_h  oh_h @ W_out[h*Dh:(h+1)*Dh, :]
        attn_out = attn_out + jnp.dot(oh, wout[c:c + dim_head, :],
                                      preferred_element_type=jnp.float32)

    x = x + attn_out + bout_ref[0].astype(jnp.float32)   # residual + to_out bias

    # ---------------- FeedForward: Residual(PreNorm(FeedForward)) ------------
    xn2 = _layernorm(x,
                     ln2_g_ref[0].astype(jnp.float32),
                     ln2_b_ref[0].astype(jnp.float32))
    h1 = jnp.dot(xn2, w1_ref[0],
                 preferred_element_type=jnp.float32) + b1_ref[0].astype(jnp.float32)
    # nn.GELU() default: exact erf-based GELU
    h1 = 0.5 * h1 * (1.0 + lax.erf(h1 * (2.0 ** -0.5)))
    ff = jnp.dot(h1, w2_ref[0],
                 preferred_element_type=jnp.float32) + b2_ref[0].astype(jnp.float32)
    x = x + ff

    x_scr[...] = x                        # carry to next layer (stays in VMEM)

    @pl.when(d == pl.num_programs(1) - 1)
    def _():
        o_ref[0] = x.astype(o_ref.dtype)  # single HBM write per batch element


# ----------------------------------------------------------------------------
# Parameter stacking (depth-major) + softmax-scale folding
# ----------------------------------------------------------------------------
def stack_layer_params(layer_params, heads, dim_head):
    inner = heads * dim_head
    scale = dim_head ** (-0.5)
    attn_ps = [lp[0] for lp in layer_params]
    ff_ps = [lp[1] for lp in layer_params]

    def vec(ps, k):   # (depth, 1, W) so biases/LN params broadcast as 2-D in-kernel
        return jnp.stack([p[k] for p in ps], axis=0)[:, None, :]

    def mat(ps, k):   # (depth, R, C)
        return jnp.stack([p[k] for p in ps], axis=0)

    w_qkv = mat(attn_ps, "w_qkv")
    # Fold the 1/sqrt(dim_head) softmax scale into the Q projection columns.
    w_qkv = w_qkv.at[:, :, :inner].multiply(jnp.asarray(scale, w_qkv.dtype))

    return {
        "ln1_g": vec(attn_ps, "ln_g"), "ln1_b": vec(attn_ps, "ln_b"),
        "w_qkv": w_qkv,
        "w_out": mat(attn_ps, "w_out"), "b_out": vec(attn_ps, "b_out"),
        "ln2_g": vec(ff_ps, "ln_g"), "ln2_b": vec(ff_ps, "ln_b"),
        "w1": mat(ff_ps, "w1"), "b1": vec(ff_ps, "b1"),
        "w2": mat(ff_ps, "w2"), "b2": vec(ff_ps, "b2"),
    }


# ----------------------------------------------------------------------------
# Wrapper: one fused pallas_call for the whole transformer
# ----------------------------------------------------------------------------
def transformer_forward(x, layer_params, heads, dim_head):
    b, n, dim = x.shape
    depth = len(layer_params)
    p = stack_layer_params(layer_params, heads, dim_head)
    inner = heads * dim_head
    mlp = p["w1"].shape[-1]

    def vec_spec(width):    # (depth, 1, width), one layer per grid step along d
        return pl.BlockSpec((1, 1, width), lambda i, d: (d, 0, 0))

    def mat_spec(rows, cols):
        return pl.BlockSpec((1, rows, cols), lambda i, d: (d, 0, 0))

    kern = functools.partial(transformer_layer_kernel, heads=heads, dim_head=dim_head)

    return pl.pallas_call(
        kern,
        out_shape=jax.ShapeDtypeStruct((b, n, dim), x.dtype),
        grid=(b, depth),  # batch outer (parallel), depth inner (sequential carry)
        in_specs=[
            pl.BlockSpec((1, n, dim), lambda i, d: (i, 0, 0)),  # x (resident per b)
            vec_spec(dim), vec_spec(dim),                        # attn LN gamma/beta
            mat_spec(dim, 3 * inner),                            # w_qkv
            mat_spec(inner, dim),                                # w_out
            vec_spec(dim),                                       # b_out
            vec_spec(dim), vec_spec(dim),                        # ff LN gamma/beta
            mat_spec(dim, mlp), vec_spec(mlp),                   # w1, b1
            mat_spec(mlp, dim), vec_spec(dim),                   # w2, b2
        ],
        out_specs=pl.BlockSpec((1, n, dim), lambda i, d: (i, 0, 0)),
        scratch_shapes=[pltpu.VMEM((n, dim), jnp.float32)],      # residual carry
        input_output_aliases={0: 0},                             # in-place residual
        compiler_params=pltpu.CompilerParams(
            dimension_semantics=("parallel", "arbitrary")),
    )(x, p["ln1_g"], p["ln1_b"], p["w_qkv"], p["w_out"], p["b_out"],
      p["ln2_g"], p["ln2_b"], p["w1"], p["b1"], p["w2"], p["b2"])


# ----------------------------------------------------------------------------
# Deterministic synthetic parameters (matches module shapes; real checkpoints
# would need nn.Linear weight transposition: PyTorch stores (out, in)).
# ----------------------------------------------------------------------------
def make_params(key, depth, dim, heads, dim_head, mlp_head, dtype=jnp.float32):
    inner = heads * dim_head
    layers = []
    for d in range(depth):
        keys = jax.random.split(jax.random.fold_in(key, d), 6)
        attn_p = {
            "ln_g": jnp.ones((dim,), dtype),
            "ln_b": jnp.zeros((dim,), dtype),
            "w_qkv": jax.random.normal(keys[0], (dim, 3 * inner), dtype) * 0.02,
            "w_out": jax.random.normal(keys[1], (inner, dim), dtype) * 0.02,
            "b_out": jax.random.normal(keys[2], (dim,), dtype) * 0.02,
        }
        ff_p = {
            "ln_g": jnp.ones((dim,), dtype),
            "ln_b": jnp.zeros((dim,), dtype),
            "w1": jax.random.normal(keys[3], (dim, mlp_head), dtype) * 0.02,
            "b1": jax.random.normal(keys[4], (mlp_head,), dtype) * 0.02,
            "w2": jax.random.normal(keys[5], (mlp_head, dim), dtype) * 0.02,
            "b2": jnp.zeros((dim,), dtype),
        }
        layers.append((attn_p, ff_p))
    return layers


# ----------------------------------------------------------------------------
if __name__ == "__main__":
    # Shapes consistent with Transformer(dim, depth, heads, dim_head, mlp_head,
    # dropout, num_channel); num_channel only feeds the unused skipcat convs.
    B, N, DIM = 2, 8, 32
    DEPTH, HEADS, DIM_HEAD, MLP_HEAD = 2, 4, 8, 64

    key = jax.random.PRNGKey(0)
    kx, kp = jax.random.split(key)
    x = jax.random.normal(kx, (B, N, DIM), jnp.float32)
    params = make_params(kp, DEPTH, DIM, HEADS, DIM_HEAD, MLP_HEAD)

    fwd = jax.jit(functools.partial(transformer_forward,
                                    heads=HEADS, dim_head=DIM_HEAD))
    out = jax.block_until_ready(fwd(x, params))

    assert out.shape == (B, N, DIM), out.shape
    assert bool(jnp.all(jnp.isfinite(out)))
    # TODO(synk): self.skipcat Conv2d layers are defined in __init__ but never
    # invoked in Transformer.forward, so they are intentionally not implemented.
    print("KERNEL_OK")
</pallas_src>

<mosaic_0001>
module attributes {stable_mosaic.version = 11 : i64} {
  func.func @transformer_layer_kernel(%arg0: i32, %arg1: i32, %arg2: memref<1x8x32xf32, #tpu.memory_space<vmem>>, %arg3: memref<1x1x32xf32, #tpu.memory_space<vmem>>, %arg4: memref<1x1x32xf32, #tpu.memory_space<vmem>>, %arg5: memref<1x32x96xf32, #tpu.memory_space<vmem>>, %arg6: memref<1x32x32xf32, #tpu.memory_space<vmem>>, %arg7: memref<1x1x32xf32, #tpu.memory_space<vmem>>, %arg8: memref<1x1x32xf32, #tpu.memory_space<vmem>>, %arg9: memref<1x1x32xf32, #tpu.memory_space<vmem>>, %arg10: memref<1x32x64xf32, #tpu.memory_space<vmem>>, %arg11: memref<1x1x64xf32, #tpu.memory_space<vmem>>, %arg12: memref<1x64x32xf32, #tpu.memory_space<vmem>>, %arg13: memref<1x1x32xf32, #tpu.memory_space<vmem>>, %arg14: memref<1x8x32xf32, #tpu.memory_space<vmem>>, %arg15: memref<8x32xf32, #tpu.memory_space<vmem>>) attributes {dimension_semantics = [#tpu.dimension_semantics<parallel>, #tpu.dimension_semantics<arbitrary>], iteration_bounds = array<i64: 2, 2>, scalar_prefetch = 0 : i64, scratch_operands = 1 : i64, tpu.core_type = #tpu.core_type<tc>, window_params = [{transform_indices = @transform_0, window_bounds = array<i64: 1, 8, 32>}, {transform_indices = @transform_1, window_bounds = array<i64: 1, 1, 32>}, {transform_indices = @transform_2, window_bounds = array<i64: 1, 1, 32>}, {transform_indices = @transform_3, window_bounds = array<i64: 1, 32, 96>}, {transform_indices = @transform_4, window_bounds = array<i64: 1, 32, 32>}, {transform_indices = @transform_5, window_bounds = array<i64: 1, 1, 32>}, {transform_indices = @transform_6, window_bounds = array<i64: 1, 1, 32>}, {transform_indices = @transform_7, window_bounds = array<i64: 1, 1, 32>}, {transform_indices = @transform_8, window_bounds = array<i64: 1, 32, 64>}, {transform_indices = @transform_9, window_bounds = array<i64: 1, 1, 64>}, {transform_indices = @transform_10, window_bounds = array<i64: 1, 64, 32>}, {transform_indices = @transform_11, window_bounds = array<i64: 1, 1, 32>}, {transform_indices = @transform_12, window_bounds = array<i64: 1, 8, 32>}]} {
    %c0_i32 = arith.constant 0 : i32
    %0 = arith.cmpi eq, %arg1, %c0_i32 : i32
    %1 = arith.extui %0 : i1 to i32
    %c0_i32_0 = arith.constant 0 : i32
    %2 = arith.cmpi ne, %1, %c0_i32_0 : i32
    scf.if %2 {
      %c0_85 = arith.constant 0 : index
      %c0_86 = arith.constant 0 : index
      %c0_87 = arith.constant 0 : index
      %177 = vector.load %arg2[%c0_85, %c0_86, %c0_87] : memref<1x8x32xf32, #tpu.memory_space<vmem>>, vector<1x8x32xf32>
      %178 = vector.shape_cast %177 : vector<1x8x32xf32> to vector<8x32xf32>
      %c0_88 = arith.constant 0 : index
      %c0_89 = arith.constant 0 : index
      %179 = vector.load %arg15[%c0_88, %c0_89] : memref<8x32xf32, #tpu.memory_space<vmem>>, vector<8x32xf32>
      tpu.vector_store %arg15[%c0_88, %c0_89], %178 {strides = array<i32>} : memref<8x32xf32, #tpu.memory_space<vmem>>, vector<8x32xf32>,
    } else {
    }
    %c0 = arith.constant 0 : index
    %c0_1 = arith.constant 0 : index
    %3 = vector.load %arg15[%c0, %c0_1] : memref<8x32xf32, #tpu.memory_space<vmem>>, vector<8x32xf32>
    %c0_2 = arith.constant 0 : index
    %c0_3 = arith.constant 0 : index
    %c0_4 = arith.constant 0 : index
    %4 = vector.load %arg3[%c0_2, %c0_3, %c0_4] : memref<1x1x32xf32, #tpu.memory_space<vmem>>, vector<1x1x32xf32>
    %5 = vector.shape_cast %4 : vector<1x1x32xf32> to vector<1x32xf32>
    %c0_5 = arith.constant 0 : index
    %c0_6 = arith.constant 0 : index
    %c0_7 = arith.constant 0 : index
    %6 = vector.load %arg4[%c0_5, %c0_6, %c0_7] : memref<1x1x32xf32, #tpu.memory_space<vmem>>, vector<1x1x32xf32>
    %7 = vector.shape_cast %6 : vector<1x1x32xf32> to vector<1x32xf32>
    %cst = arith.constant dense<0.000000e+00> : vector<8xf32>
    %8 = vector.multi_reduction <add>, %3, %cst [1] : vector<8x32xf32> to vector<8xf32>
    %9 = vector.shape_cast %8 : vector<8xf32> to vector<8x1xf32>
    %cst_8 = arith.constant 3.200000e+01 : f32
    %10 = vector.broadcast %cst_8 : f32 to vector<8x1xf32>
    %11 = arith.divf %9, %10 : vector<8x1xf32>
    %12 = vector.broadcast %11 : vector<8x1xf32> to vector<8x32xf32>
    %13 = arith.subf %3, %12 : vector<8x32xf32>
    %14 = arith.mulf %13, %13 : vector<8x32xf32>
    %cst_9 = arith.constant dense<0.000000e+00> : vector<8xf32>
    %15 = vector.multi_reduction <add>, %14, %cst_9 [1] : vector<8x32xf32> to vector<8xf32>
    %16 = vector.shape_cast %15 : vector<8xf32> to vector<8x1xf32>
    %cst_10 = arith.constant 3.200000e+01 : f32
    %17 = vector.broadcast %cst_10 : f32 to vector<8x1xf32>
    %18 = arith.divf %16, %17 : vector<8x1xf32>
    %19 = vector.broadcast %11 : vector<8x1xf32> to vector<8x32xf32>
    %20 = arith.subf %3, %19 : vector<8x32xf32>
    %cst_11 = arith.constant 9.99999974E-6 : f32
    %21 = vector.broadcast %cst_11 : f32 to vector<8x1xf32>
    %22 = arith.addf %18, %21 : vector<8x1xf32>
    %23 = math.rsqrt %22 : vector<8x1xf32>
    %24 = vector.broadcast %23 : vector<8x1xf32> to vector<8x32xf32>
    %25 = arith.mulf %20, %24 : vector<8x32xf32>
    %26 = vector.broadcast %5 : vector<1x32xf32> to vector<8x32xf32>
    %27 = arith.mulf %25, %26 : vector<8x32xf32>
    %28 = vector.broadcast %7 : vector<1x32xf32> to vector<8x32xf32>
    %29 = arith.addf %27, %28 : vector<8x32xf32>
    %c0_12 = arith.constant 0 : index
    %c0_13 = arith.constant 0 : index
    %c0_14 = arith.constant 0 : index
    %30 = vector.load %arg5[%c0_12, %c0_13, %c0_14] : memref<1x32x96xf32, #tpu.memory_space<vmem>>, vector<1x32x96xf32>
    %31 = vector.shape_cast %30 : vector<1x32x96xf32> to vector<32x96xf32>
    %c0_15 = arith.constant 0 : index
    %c0_16 = arith.constant 0 : index
    %c0_17 = arith.constant 0 : index
    %32 = vector.load %arg6[%c0_15, %c0_16, %c0_17] : memref<1x32x32xf32, #tpu.memory_space<vmem>>, vector<1x32x32xf32>
    %33 = vector.shape_cast %32 : vector<1x32x32xf32> to vector<32x32xf32>
    %cst_18 = arith.constant 0.000000e+00 : f32
    %34 = vector.broadcast %cst_18 : f32 to vector<8x32xf32>
    %35 = vector.extract_strided_slice %31 {offsets = [0, 0], sizes = [32, 8], strides = [1, 1]} : vector<32x96xf32> to vector<32x8xf32>
    %cst_19 = arith.constant dense<0.000000e+00> : vector<8x8xf32>
    %36 = tpu.matmul %29, %35, %cst_19 {dimension_numbers = #tpu.dot_dimension_numbers<[1], [0], [0], [1], [0, 0, 1, 1], [], []>} : vector<8x32xf32>, vector<32x8xf32>, vector<8x8xf32> -> vector<8x8xf32>
    %37 = vector.extract_strided_slice %31 {offsets = [0, 32], sizes = [32, 8], strides = [1, 1]} : vector<32x96xf32> to vector<32x8xf32>
    %cst_20 = arith.constant dense<0.000000e+00> : vector<8x8xf32>
    %38 = tpu.matmul %29, %37, %cst_20 {dimension_numbers = #tpu.dot_dimension_numbers<[1], [0], [0], [1], [0, 0, 1, 1], [], []>} : vector<8x32xf32>, vector<32x8xf32>, vector<8x8xf32> -> vector<8x8xf32>
    %39 = vector.extract_strided_slice %31 {offsets = [0, 64], sizes = [32, 8], strides = [1, 1]} : vector<32x96xf32> to vector<32x8xf32>
    %cst_21 = arith.constant dense<0.000000e+00> : vector<8x8xf32>
    %40 = tpu.matmul %29, %39, %cst_21 {dimension_numbers = #tpu.dot_dimension_numbers<[1], [0], [0], [1], [0, 0, 1, 1], [], []>} : vector<8x32xf32>, vector<32x8xf32>, vector<8x8xf32> -> vector<8x8xf32>
    %cst_22 = arith.constant dense<0.000000e+00> : vector<8x8xf32>
    %41 = tpu.matmul %36, %38, %cst_22 {dimension_numbers = #tpu.dot_dimension_numbers<[1], [1], [0], [0], [0, 0, 1, 0], [], []>} : vector<8x8xf32>, vector<8x8xf32>, vector<8x8xf32> -> vector<8x8xf32>
    %cst_23 = arith.constant dense<0xFF800000> : vector<8xf32>
    %42 = vector.multi_reduction <maximumf>, %41, %cst_23 [1] : vector<8x8xf32> to vector<8xf32>
    %43 = vector.shape_cast %42 : vector<8xf32> to vector<8x1xf32>
    %44 = vector.broadcast %43 : vector<8x1xf32> to vector<8x8xf32>
    %45 = arith.subf %41, %44 : vector<8x8xf32>
    %46 = math.exp %45 : vector<8x8xf32>
    %cst_24 = arith.constant dense<0.000000e+00> : vector<8xf32>
    %47 = vector.multi_reduction <add>, %46, %cst_24 [1] : vector<8x8xf32> to vector<8xf32>
    %48 = vector.shape_cast %47 : vector<8xf32> to vector<8x1xf32>
    %49 = tpu.reciprocal %48 {approx = true} : vector<8x1xf32> -> vector<8x1xf32>
    %50 = vector.broadcast %49 : vector<8x1xf32> to vector<8x8xf32>
    %51 = arith.mulf %46, %50 : vector<8x8xf32>
    %cst_25 = arith.constant dense<0.000000e+00> : vector<8x8xf32>
    %52 = tpu.matmul %51, %40, %cst_25 {dimension_numbers = #tpu.dot_dimension_numbers<[1], [0], [0], [1], [0, 0, 1, 1], [], []>} : vector<8x8xf32>, vector<8x8xf32>, vector<8x8xf32> -> vector<8x8xf32>
    %53 = vector.extract_strided_slice %33 {offsets = [0, 0], sizes = [8, 32], strides = [1, 1]} : vector<32x32xf32> to vector<8x32xf32>
    %cst_26 = arith.constant dense<0.000000e+00> : vector<8x32xf32>
    %54 = tpu.matmul %52, %53, %cst_26 {dimension_numbers = #tpu.dot_dimension_numbers<[1], [0], [0], [1], [0, 0, 1, 1], [], []>} : vector<8x8xf32>, vector<8x32xf32>, vector<8x32xf32> -> vector<8x32xf32>
    %55 = arith.addf %34, %54 : vector<8x32xf32>
    %56 = vector.extract_strided_slice %31 {offsets = [0, 8], sizes = [32, 8], strides = [1, 1]} : vector<32x96xf32> to vector<32x8xf32>
    %cst_27 = arith.constant dense<0.000000e+00> : vector<8x8xf32>
    %57 = tpu.matmul %29, %56, %cst_27 {dimension_numbers = #tpu.dot_dimension_numbers<[1], [0], [0], [1], [0, 0, 1, 1], [], []>} : vector<8x32xf32>, vector<32x8xf32>, vector<8x8xf32> -> vector<8x8xf32>
    %58 = vector.extract_strided_slice %31 {offsets = [0, 40], sizes = [32, 8], strides = [1, 1]} : vector<32x96xf32> to vector<32x8xf32>
    %cst_28 = arith.constant dense<0.000000e+00> : vector<8x8xf32>
    %59 = tpu.matmul %29, %58, %cst_28 {dimension_numbers = #tpu.dot_dimension_numbers<[1], [0], [0], [1], [0, 0, 1, 1], [], []>} : vector<8x32xf32>, vector<32x8xf32>, vector<8x8xf32> -> vector<8x8xf32>
    %60 = vector.extract_strided_slice %31 {offsets = [0, 72], sizes = [32, 8], strides = [1, 1]} : vector<32x96xf32> to vector<32x8xf32>
    %cst_29 = arith.constant dense<0.000000e+00> : vector<8x8xf32>
    %61 = tpu.matmul %29, %60, %cst_29 {dimension_numbers = #tpu.dot_dimension_numbers<[1], [0], [0], [1], [0, 0, 1, 1], [], []>} : vector<8x32xf32>, vector<32x8xf32>, vector<8x8xf32> -> vector<8x8xf32>
    %cst_30 = arith.constant dense<0.000000e+00> : vector<8x8xf32>
    %62 = tpu.matmul %57, %59, %cst_30 {dimension_numbers = #tpu.dot_dimension_numbers<[1], [1], [0], [0], [0, 0, 1, 0], [], []>} : vector<8x8xf32>, vector<8x8xf32>, vector<8x8xf32> -> vector<8x8xf32>
    %cst_31 = arith.constant dense<0xFF800000> : vector<8xf32>
    %63 = vector.multi_reduction <maximumf>, %62, %cst_31 [1] : vector<8x8xf32> to vector<8xf32>
    %64 = vector.shape_cast %63 : vector<8xf32> to vector<8x1xf32>
    %65 = vector.broadcast %64 : vector<8x1xf32> to vector<8x8xf32>
    %66 = arith.subf %62, %65 : vector<8x8xf32>
    %67 = math.exp %66 : vector<8x8xf32>
    %cst_32 = arith.constant dense<0.000000e+00> : vector<8xf32>
    %68 = vector.multi_reduction <add>, %67, %cst_32 [1] : vector<8x8xf32> to vector<8xf32>
    %69 = vector.shape_cast %68 : vector<8xf32> to vector<8x1xf32>
    %70 = tpu.reciprocal %69 {approx = true} : vector<8x1xf32> -> vector<8x1xf32>
    %71 = vector.broadcast %70 : vector<8x1xf32> to vector<8x8xf32>
    %72 = arith.mulf %67, %71 : vector<8x8xf32>
    %cst_33 = arith.constant dense<0.000000e+00> : vector<8x8xf32>
    %73 = tpu.matmul %72, %61, %cst_33 {dimension_numbers = #tpu.dot_dimension_numbers<[1], [0], [0], [1], [0, 0, 1, 1], [], []>} : vector<8x8xf32>, vector<8x8xf32>, vector<8x8xf32> -> vector<8x8xf32>
    %74 = vector.extract_strided_slice %33 {offsets = [8, 0], sizes = [8, 32], strides = [1, 1]} : vector<32x32xf32> to vector<8x32xf32>
    %cst_34 = arith.constant dense<0.000000e+00> : vector<8x32xf32>
    %75 = tpu.matmul %73, %74, %cst_34 {dimension_numbers = #tpu.dot_dimension_numbers<[1], [0], [0], [1], [0, 0, 1, 1], [], []>} : vector<8x8xf32>, vector<8x32xf32>, vector<8x32xf32> -> vector<8x32xf32>
    %76 = arith.addf %55, %75 : vector<8x32xf32>
    %77 = vector.extract_strided_slice %31 {offsets = [0, 16], sizes = [32, 8], strides = [1, 1]} : vector<32x96xf32> to vector<32x8xf32>
    %cst_35 = arith.constant dense<0.000000e+00> : vector<8x8xf32>
    %78 = tpu.matmul %29, %77, %cst_35 {dimension_numbers = #tpu.dot_dimension_numbers<[1], [0], [0], [1], [0, 0, 1, 1], [], []>} : vector<8x32xf32>, vector<32x8xf32>, vector<8x8xf32> -> vector<8x8xf32>
    %79 = vector.extract_strided_slice %31 {offsets = [0, 48], sizes = [32, 8], strides = [1, 1]} : vector<32x96xf32> to vector<32x8xf32>
    %cst_36 = arith.constant dense<0.000000e+00> : vector<8x8xf32>
    %80 = tpu.matmul %29, %79, %cst_36 {dimension_numbers = #tpu.dot_dimension_numbers<[1], [0], [0], [1], [0, 0, 1, 1], [], []>} : vector<8x32xf32>, vector<32x8xf32>, vector<8x8xf32> -> vector<8x8xf32>
    %81 = vector.extract_strided_slice %31 {offsets = [0, 80], sizes = [32, 8], strides = [1, 1]} : vector<32x96xf32> to vector<32x8xf32>
    %cst_37 = arith.constant dense<0.000000e+00> : vector<8x8xf32>
    %82 = tpu.matmul %29, %81, %cst_37 {dimension_numbers = #tpu.dot_dimension_numbers<[1], [0], [0], [1], [0, 0, 1, 1], [], []>} : vector<8x32xf32>, vector<32x8xf32>, vector<8x8xf32> -> vector<8x8xf32>
    %cst_38 = arith.constant dense<0.000000e+00> : vector<8x8xf32>
    %83 = tpu.matmul %78, %80, %cst_38 {dimension_numbers = #tpu.dot_dimension_numbers<[1], [1], [0], [0], [0, 0, 1, 0], [], []>} : vector<8x8xf32>, vector<8x8xf32>, vector<8x8xf32> -> vector<8x8xf32>
    %cst_39 = arith.constant dense<0xFF800000> : vector<8xf32>
    %84 = vector.multi_reduction <maximumf>, %83, %cst_39 [1] : vector<8x8xf32> to vector<8xf32>
    %85 = vector.shape_cast %84 : vector<8xf32> to vector<8x1xf32>
    %86 = vector.broadcast %85 : vector<8x1xf32> to vector<8x8xf32>
    %87 = arith.subf %83, %86 : vector<8x8xf32>
    %88 = math.exp %87 : vector<8x8xf32>
    %cst_40 = arith.constant dense<0.000000e+00> : vector<8xf32>
    %89 = vector.multi_reduction <add>, %88, %cst_40 [1] : vector<8x8xf32> to vector<8xf32>
    %90 = vector.shape_cast %89 : vector<8xf32> to vector<8x1xf32>
    %91 = tpu.reciprocal %90 {approx = true} : vector<8x1xf32> -> vector<8x1xf32>
    %92 = vector.broadcast %91 : vector<8x1xf32> to vector<8x8xf32>
    %93 = arith.mulf %88, %92 : vector<8x8xf32>
    %cst_41 = arith.constant dense<0.000000e+00> : vector<8x8xf32>
    %94 = tpu.matmul %93, %82, %cst_41 {dimension_numbers = #tpu.dot_dimension_numbers<[1], [0], [0], [1], [0, 0, 1, 1], [], []>} : vector<8x8xf32>, vector<8x8xf32>, vector<8x8xf32> -> vector<8x8xf32>
    %95 = vector.extract_strided_slice %33 {offsets = [16, 0], sizes = [8, 32], strides = [1, 1]} : vector<32x32xf32> to vector<8x32xf32>
    %cst_42 = arith.constant dense<0.000000e+00> : vector<8x32xf32>
    %96 = tpu.matmul %94, %95, %cst_42 {dimension_numbers = #tpu.dot_dimension_numbers<[1], [0], [0], [1], [0, 0, 1, 1], [], []>} : vector<8x8xf32>, vector<8x32xf32>, vector<8x32xf32> -> vector<8x32xf32>
    %97 = arith.addf %76, %96 : vector<8x32xf32>
    %98 = vector.extract_strided_slice %31 {offsets = [0, 24], sizes = [32, 8], strides = [1, 1]} : vector<32x96xf32> to vector<32x8xf32>
    %cst_43 = arith.constant dense<0.000000e+00> : vector<8x8xf32>
    %99 = tpu.matmul %29, %98, %cst_43 {dimension_numbers = #tpu.dot_dimension_numbers<[1], [0], [0], [1], [0, 0, 1, 1], [], []>} : vector<8x32xf32>, vector<32x8xf32>, vector<8x8xf32> -> vector<8x8xf32>
    %100 = vector.extract_strided_slice %31 {offsets = [0, 56], sizes = [32, 8], strides = [1, 1]} : vector<32x96xf32> to vector<32x8xf32>
    %cst_44 = arith.constant dense<0.000000e+00> : vector<8x8xf32>
    %101 = tpu.matmul %29, %100, %cst_44 {dimension_numbers = #tpu.dot_dimension_numbers<[1], [0], [0], [1], [0, 0, 1, 1], [], []>} : vector<8x32xf32>, vector<32x8xf32>, vector<8x8xf32> -> vector<8x8xf32>
    %102 = vector.extract_strided_slice %31 {offsets = [0, 88], sizes = [32, 8], strides = [1, 1]} : vector<32x96xf32> to vector<32x8xf32>
    %cst_45 = arith.constant dense<0.000000e+00> : vector<8x8xf32>
    %103 = tpu.matmul %29, %102, %cst_45 {dimension_numbers = #tpu.dot_dimension_numbers<[1], [0], [0], [1], [0, 0, 1, 1], [], []>} : vector<8x32xf32>, vector<32x8xf32>, vector<8x8xf32> -> vector<8x8xf32>
    %cst_46 = arith.constant dense<0.000000e+00> : vector<8x8xf32>
    %104 = tpu.matmul %99, %101, %cst_46 {dimension_numbers = #tpu.dot_dimension_numbers<[1], [1], [0], [0], [0, 0, 1, 0], [], []>} : vector<8x8xf32>, vector<8x8xf32>, vector<8x8xf32> -> vector<8x8xf32>
    %cst_47 = arith.constant dense<0xFF800000> : vector<8xf32>
    %105 = vector.multi_reduction <maximumf>, %104, %cst_47 [1] : vector<8x8xf32> to vector<8xf32>
    %106 = vector.shape_cast %105 : vector<8xf32> to vector<8x1xf32>
    %107 = vector.broadcast %106 : vector<8x1xf32> to vector<8x8xf32>
    %108 = arith.subf %104, %107 : vector<8x8xf32>
    %109 = math.exp %108 : vector<8x8xf32>
    %cst_48 = arith.constant dense<0.000000e+00> : vector<8xf32>
    %110 = vector.multi_reduction <add>, %109, %cst_48 [1] : vector<8x8xf32> to vector<8xf32>
    %111 = vector.shape_cast %110 : vector<8xf32> to vector<8x1xf32>
    %112 = tpu.reciprocal %111 {approx = true} : vector<8x1xf32> -> vector<8x1xf32>
    %113 = vector.broadcast %112 : vector<8x1xf32> to vector<8x8xf32>
    %114 = arith.mulf %109, %113 : vector<8x8xf32>
    %cst_49 = arith.constant dense<0.000000e+00> : vector<8x8xf32>
    %115 = tpu.matmul %114, %103, %cst_49 {dimension_numbers = #tpu.dot_dimension_numbers<[1], [0], [0], [1], [0, 0, 1, 1], [], []>} : vector<8x8xf32>, vector<8x8xf32>, vector<8x8xf32> -> vector<8x8xf32>
    %116 = vector.extract_strided_slice %33 {offsets = [24, 0], sizes = [8, 32], strides = [1, 1]} : vector<32x32xf32> to vector<8x32xf32>
    %cst_50 = arith.constant dense<0.000000e+00> : vector<8x32xf32>
    %117 = tpu.matmul %115, %116, %cst_50 {dimension_numbers = #tpu.dot_dimension_numbers<[1], [0], [0], [1], [0, 0, 1, 1], [], []>} : vector<8x8xf32>, vector<8x32xf32>, vector<8x32xf32> -> vector<8x32xf32>
    %118 = arith.addf %97, %117 : vector<8x32xf32>
    %119 = arith.addf %3, %118 : vector<8x32xf32>
    %c0_51 = arith.constant 0 : index
    %c0_52 = arith.constant 0 : index
    %c0_53 = arith.constant 0 : index
    %120 = vector.load %arg7[%c0_51, %c0_52, %c0_53] : memref<1x1x32xf32, #tpu.memory_space<vmem>>, vector<1x1x32xf32>
    %121 = vector.shape_cast %120 : vector<1x1x32xf32> to vector<1x32xf32>
    %122 = vector.broadcast %121 : vector<1x32xf32> to vector<8x32xf32>
    %123 = arith.addf %119, %122 : vector<8x32xf32>
    %c0_54 = arith.constant 0 : index
    %c0_55 = arith.constant 0 : index
    %c0_56 = arith.constant 0 : index
    %124 = vector.load %arg8[%c0_54, %c0_55, %c0_56] : memref<1x1x32xf32, #tpu.memory_space<vmem>>, vector<1x1x32xf32>
    %125 = vector.shape_cast %124 : vector<1x1x32xf32> to vector<1x32xf32>
    %c0_57 = arith.constant 0 : index
    %c0_58 = arith.constant 0 : index
    %c0_59 = arith.constant 0 : index
    %126 = vector.load %arg9[%c0_57, %c0_58, %c0_59] : memref<1x1x32xf32, #tpu.memory_space<vmem>>, vector<1x1x32xf32>
    %127 = vector.shape_cast %126 : vector<1x1x32xf32> to vector<1x32xf32>
    %cst_60 = arith.constant dense<0.000000e+00> : vector<8xf32>
    %128 = vector.multi_reduction <add>, %123, %cst_60 [1] : vector<8x32xf32> to vector<8xf32>
    %129 = vector.shape_cast %128 : vector<8xf32> to vector<8x1xf32>
    %cst_61 = arith.constant 3.200000e+01 : f32
    %130 = vector.broadcast %cst_61 : f32 to vector<8x1xf32>
    %131 = arith.divf %129, %130 : vector<8x1xf32>
    %132 = vector.broadcast %131 : vector<8x1xf32> to vector<8x32xf32>
    %133 = arith.subf %123, %132 : vector<8x32xf32>
    %134 = arith.mulf %133, %133 : vector<8x32xf32>
    %cst_62 = arith.constant dense<0.000000e+00> : vector<8xf32>
    %135 = vector.multi_reduction <add>, %134, %cst_62 [1] : vector<8x32xf32> to vector<8xf32>
    %136 = vector.shape_cast %135 : vector<8xf32> to vector<8x1xf32>
    %cst_63 = arith.constant 3.200000e+01 : f32
    %137 = vector.broadcast %cst_63 : f32 to vector<8x1xf32>
    %138 = arith.divf %136, %137 : vector<8x1xf32>
    %139 = vector.broadcast %131 : vector<8x1xf32> to vector<8x32xf32>
    %140 = arith.subf %123, %139 : vector<8x32xf32>
    %cst_64 = arith.constant 9.99999974E-6 : f32
    %141 = vector.broadcast %cst_64 : f32 to vector<8x1xf32>
    %142 = arith.addf %138, %141 : vector<8x1xf32>
    %143 = math.rsqrt %142 : vector<8x1xf32>
    %144 = vector.broadcast %143 : vector<8x1xf32> to vector<8x32xf32>
    %145 = arith.mulf %140, %144 : vector<8x32xf32>
    %146 = vector.broadcast %125 : vector<1x32xf32> to vector<8x32xf32>
    %147 = arith.mulf %145, %146 : vector<8x32xf32>
    %148 = vector.broadcast %127 : vector<1x32xf32> to vector<8x32xf32>
    %149 = arith.addf %147, %148 : vector<8x32xf32>
    %c0_65 = arith.constant 0 : index
    %c0_66 = arith.constant 0 : index
    %c0_67 = arith.constant 0 : index
    %150 = vector.load %arg10[%c0_65, %c0_66, %c0_67] : memref<1x32x64xf32, #tpu.memory_space<vmem>>, vector<1x32x64xf32>
    %151 = vector.shape_cast %150 : vector<1x32x64xf32> to vector<32x64xf32>
    %cst_68 = arith.constant dense<0.000000e+00> : vector<8x64xf32>
    %152 = tpu.matmul %149, %151, %cst_68 {dimension_numbers = #tpu.dot_dimension_numbers<[1], [0], [0], [1], [0, 0, 1, 1], [], []>} : vector<8x32xf32>, vector<32x64xf32>, vector<8x64xf32> -> vector<8x64xf32>
    %c0_69 = arith.constant 0 : index
    %c0_70 = arith.constant 0 : index
    %c0_71 = arith.constant 0 : index
    %153 = vector.load %arg11[%c0_69, %c0_70, %c0_71] : memref<1x1x64xf32, #tpu.memory_space<vmem>>, vector<1x1x64xf32>
    %154 = vector.shape_cast %153 : vector<1x1x64xf32> to vector<1x64xf32>
    %155 = vector.broadcast %154 : vector<1x64xf32> to vector<8x64xf32>
    %156 = arith.addf %152, %155 : vector<8x64xf32>
    %cst_72 = arith.constant 5.000000e-01 : f32
    %157 = vector.broadcast %cst_72 : f32 to vector<8x64xf32>
    %158 = arith.mulf %157, %156 : vector<8x64xf32>
    %cst_73 = arith.constant 0.707106769 : f32
    %159 = vector.broadcast %cst_73 : f32 to vector<8x64xf32>
    %160 = arith.mulf %156, %159 : vector<8x64xf32>
    %161 = math.erf %160 : vector<8x64xf32>
    %cst_74 = arith.constant 1.000000e+00 : f32
    %162 = vector.broadcast %cst_74 : f32 to vector<8x64xf32>
    %163 = arith.addf %162, %161 : vector<8x64xf32>
    %164 = arith.mulf %158, %163 : vector<8x64xf32>
    %c0_75 = arith.constant 0 : index
    %c0_76 = arith.constant 0 : index
    %c0_77 = arith.constant 0 : index
    %165 = vector.load %arg12[%c0_75, %c0_76, %c0_77] : memref<1x64x32xf32, #tpu.memory_space<vmem>>, vector<1x64x32xf32>
    %166 = vector.shape_cast %165 : vector<1x64x32xf32> to vector<64x32xf32>
    %cst_78 = arith.constant dense<0.000000e+00> : vector<8x32xf32>
    %167 = tpu.matmul %164, %166, %cst_78 {dimension_numbers = #tpu.dot_dimension_numbers<[1], [0], [0], [1], [0, 0, 1, 1], [], []>} : vector<8x64xf32>, vector<64x32xf32>, vector<8x32xf32> -> vector<8x32xf32>
    %c0_79 = arith.constant 0 : index
    %c0_80 = arith.constant 0 : index
    %c0_81 = arith.constant 0 : index
    %168 = vector.load %arg13[%c0_79, %c0_80, %c0_81] : memref<1x1x32xf32, #tpu.memory_space<vmem>>, vector<1x1x32xf32>
    %169 = vector.shape_cast %168 : vector<1x1x32xf32> to vector<1x32xf32>
    %170 = vector.broadcast %169 : vector<1x32xf32> to vector<8x32xf32>
    %171 = arith.addf %167, %170 : vector<8x32xf32>
    %172 = arith.addf %123, %171 : vector<8x32xf32>
    %c0_82 = arith.constant 0 : index
    %c0_83 = arith.constant 0 : index
    %173 = vector.load %arg15[%c0_82, %c0_83] : memref<8x32xf32, #tpu.memory_space<vmem>>, vector<8x32xf32>
    tpu.vector_store %arg15[%c0_82, %c0_83], %172 {strides = array<i32>} : memref<8x32xf32, #tpu.memory_space<vmem>>, vector<8x32xf32>,
    %c1_i32 = arith.constant 1 : i32
    %174 = arith.cmpi eq, %arg1, %c1_i32 : i32
    %175 = arith.extui %174 : i1 to i32
    %c0_i32_84 = arith.constant 0 : i32
    %176 = arith.cmpi ne, %175, %c0_i32_84 : i32
    scf.if %176 {
      %c0_85 = arith.constant 0 : index
      %c0_86 = arith.constant 0 : index
      %c0_87 = arith.constant 0 : index
      %177 = vector.load %arg14[%c0_85, %c0_86, %c0_87] : memref<1x8x32xf32, #tpu.memory_space<vmem>>, vector<1x8x32xf32>
      %178 = vector.shape_cast %177 : vector<1x8x32xf32> to vector<8x32xf32>
      %179 = vector.shape_cast %172 : vector<8x32xf32> to vector<1x8x32xf32>
      tpu.vector_store %arg14[%c0_85, %c0_86, %c0_87], %179 {strides = array<i32>} : memref<1x8x32xf32, #tpu.memory_space<vmem>>, vector<1x8x32xf32>,
    } else {
    }
    return
  }
  func.func @transform_0(%arg0: i32, %arg1: i32) -> (i32, i32, i32) {
    %c0_i32 = arith.constant 0 : i32
    %c0_i32_0 = arith.constant 0 : i32
    %c0_i32_1 = arith.constant 0 : i32
    return %arg0, %c0_i32, %c0_i32_0 : i32, i32, i32
  }
  func.func @transform_1(%arg0: i32, %arg1: i32) -> (i32, i32, i32) {
    %c0_i32 = arith.constant 0 : i32
    %c0_i32_0 = arith.constant 0 : i32
    %c0_i32_1 = arith.constant 0 : i32
    return %arg1, %c0_i32, %c0_i32_0 : i32, i32, i32
  }
  func.func @transform_2(%arg0: i32, %arg1: i32) -> (i32, i32, i32) {
    %c0_i32 = arith.constant 0 : i32
    %c0_i32_0 = arith.constant 0 : i32
    %c0_i32_1 = arith.constant 0 : i32
    return %arg1, %c0_i32, %c0_i32_0 : i32, i32, i32
  }
  func.func @transform_3(%arg0: i32, %arg1: i32) -> (i32, i32, i32) {
    %c0_i32 = arith.constant 0 : i32
    %c0_i32_0 = arith.constant 0 : i32
    %c0_i32_1 = arith.constant 0 : i32
    return %arg1, %c0_i32, %c0_i32_0 : i32, i32, i32
  }
  func.func @transform_4(%arg0: i32, %arg1: i32) -> (i32, i32, i32) {
    %c0_i32 = arith.constant 0 : i32
    %c0_i32_0 = arith.constant 0 : i32
    %c0_i32_1 = arith.constant 0 : i32
    return %arg1, %c0_i32, %c0_i32_0 : i32, i32, i32
  }
  func.func @transform_5(%arg0: i32, %arg1: i32) -> (i32, i32, i32) {
    %c0_i32 = arith.constant 0 : i32
    %c0_i32_0 = arith.constant 0 : i32
    %c0_i32_1 = arith.constant 0 : i32
    return %arg1, %c0_i32, %c0_i32_0 : i32, i32, i32
  }
  func.func @transform_6(%arg0: i32, %arg1: i32) -> (i32, i32, i32) {
    %c0_i32 = arith.constant 0 : i32
    %c0_i32_0 = arith.constant 0 : i32
    %c0_i32_1 = arith.constant 0 : i32
    return %arg1, %c0_i32, %c0_i32_0 : i32, i32, i32
  }
  func.func @transform_7(%arg0: i32, %arg1: i32) -> (i32, i32, i32) {
    %c0_i32 = arith.constant 0 : i32
    %c0_i32_0 = arith.constant 0 : i32
    %c0_i32_1 = arith.constant 0 : i32
    return %arg1, %c0_i32, %c0_i32_0 : i32, i32, i32
  }
  func.func @transform_8(%arg0: i32, %arg1: i32) -> (i32, i32, i32) {
    %c0_i32 = arith.constant 0 : i32
    %c0_i32_0 = arith.constant 0 : i32
    %c0_i32_1 = arith.constant 0 : i32
    return %arg1, %c0_i32, %c0_i32_0 : i32, i32, i32
  }
  func.func @transform_9(%arg0: i32, %arg1: i32) -> (i32, i32, i32) {
    %c0_i32 = arith.constant 0 : i32
    %c0_i32_0 = arith.constant 0 : i32
    %c0_i32_1 = arith.constant 0 : i32
    return %arg1, %c0_i32, %c0_i32_0 : i32, i32, i32
  }
  func.func @transform_10(%arg0: i32, %arg1: i32) -> (i32, i32, i32) {
    %c0_i32 = arith.constant 0 : i32
    %c0_i32_0 = arith.constant 0 : i32
    %c0_i32_1 = arith.constant 0 : i32
    return %arg1, %c0_i32, %c0_i32_0 : i32, i32, i32
  }
  func.func @transform_11(%arg0: i32, %arg1: i32) -> (i32, i32, i32) {
    %c0_i32 = arith.constant 0 : i32
    %c0_i32_0 = arith.constant 0 : i32
    %c0_i32_1 = arith.constant 0 : i32
    return %arg1, %c0_i32, %c0_i32_0 : i32, i32, i32
  }
  func.func @transform_12(%arg0: i32, %arg1: i32) -> (i32, i32, i32) {
    %c0_i32 = arith.constant 0 : i32
    %c0_i32_0 = arith.constant 0 : i32
    %c0_i32_1 = arith.constant 0 : i32
    return %arg0, %c0_i32, %c0_i32_0 : i32, i32, i32
  }
}

</mosaic_0001>

<bundles_post_ra>
// kernel: transformer_forward.1
= control target key start
LH: loop header
LB: loop body
LE: loop exit
PB: predicated region body
PF: predicated region fallthrough
CT: control target
= control target key end

     0   :  { %s4236_s0 = inlined_call_operand.hbm [shape: f32[2,8,32], index: 0, kind: input, shape index: {}, may-alias: {0,12}]   ;;  %s4237_s1 = inlined_call_operand.vmem [shape: f32[2,1,32], index: 1, kind: input, shape index: {}]   ;;  %s4238_s2 = inlined_call_operand.vmem [shape: f32[2,1,32], index: 2, kind: input, shape index: {}]   ;;  %s4239_s3 = inlined_call_operand.vmem [shape: f32[2,32,96], index: 3, kind: input, shape index: {}]   ;;  %s4240_s4 = inlined_call_operand.vmem [shape: f32[2,32,32], index: 4, kind: input, shape index: {}]   ;;  %s4241_s5 = inlined_call_operand.vmem [shape: f32[2,1,32], index: 5, kind: input, shape index: {}]   ;;  %s4242_s6 = inlined_call_operand.vmem [shape: f32[2,1,32], index: 6, kind: input, shape index: {}]   ;;  %s4243_s7 = inlined_call_operand.vmem [shape: f32[2,1,32], index: 7, kind: input, shape index: {}]   ;;  %s4244_s8 = inlined_call_operand.vmem [shape: f32[2,32,64], index: 8, kind: input, shape index: {}]   ;;  %s4245_s9 = inlined_call_operand.vmem [shape: f32[2,1,64], index: 9, kind: input, shape index: {}]   ;;  %s4246_s10 = inlined_call_operand.vmem [shape: f32[2,64,32], index: 10, kind: input, shape index: {}]   ;;  %s4247_s11 = inlined_call_operand.vmem [shape: f32[2,1,32], index: 11, kind: input, shape index: {}]   ;;  %s4248_s12 = inlined_call_operand.hbm [shape: f32[2,8,32], index: 12, kind: output, shape index: {}, may-alias: {0,12}]  }
   0x1   :  { %4262 = sst [smem:[#allocation22_spill]] %s4236_s0 }
   0x2   :  { %4263 = sst [smem:[#allocation23_spill]] %s4239_s3 }
   0x3   :  { %4264 = sst [smem:[#allocation24_spill]] %s4240_s4 }
   0x4   :  { %4265 = sst [smem:[#allocation25_spill]] %s4242_s6 }
   0x5   :  { %4266 = sst [smem:[#allocation26_spill]] %s4246_s10 }
   0x6   :  { %4267 = sst [smem:[#allocation27_spill]] %s4247_s11 }
   0x7   :  { %4268 = sst [smem:[#allocation28_spill]] %s4248_s12 }
   0x8   :  { %17 = vsyncpa [#allocation4], 0 }
   0x9   :  { %19 = vsyncpa [#allocation4 + $0x1], 0 }
   0xa   :  { %20 = vsyncpa [#allocation5], 0 }
   0xb   :  { %22 = vsyncpa [#allocation5 + $0x1], 0  ;;  %s3712_s21 = smov 0   ;;  %s3714_s22 = smov 0  }
   0xc   :  { %s3716_s23 = smov 0   ;;  %s3718_s24 = smov 0  }
   0xd   :  { %s3720_s25 = smov 0   ;;  %s3722_s26 = smov 0  }
   0xe   :  { %s3724_s27 = smov 0   ;;  %s3726_s28 = smov 0  }
   0xf LB: > { %4269 = sst [smem:[#allocation9_spill]] %s3602_s21  ;;  %s3009_s29 = sadd.s32 4294967295, %s3630_s28   ;;  %s3630_s28 = sphi %s3726_s28, %s28_s28   ;;  %s3626_s27 = sphi %s3724_s27, %s4313_s27   ;;  %s3622_s26 = sphi %s3722_s26, %s4312_s26   ;;  %s3618_s25 = sphi %s3720_s25, %s4311_s25   ;;  %s3614_s24 = sphi %s3718_s24, %s4310_s24   ;;  %s3610_s23 = sphi %s3716_s23, %s4309_s23   ;;  %s3606_s22 = sphi %s3714_s22, %s4308_s22   ;;  %s3602_s21 = sphi %s3712_s21, %s4307_s21  }
  0x10   : > { %4270 = sst [smem:[#allocation10_spill]] %s3606_s22  ;;  %s3010_s30 = sadd.s32 4294967294, %s3630_s28  }
  0x11   : > { %4271 = sst [smem:[#allocation11_spill]] %s3610_s23  ;;  %s37_s13 = sadd.s32 1, %s3622_s26 }
  0x12   : > { %4272 = sst [smem:[#allocation12_spill]] %s3618_s25  ;;  %s40_s14 = sadd.s32 1, %s3626_s27 }
  0x13   : > { %4273 = sst [smem:[#allocation13_spill]] %s3622_s26  ;;  %p38_p0 = scmp.ge.s32.totalorder %s37_s13, 2 }
  0x14   : > { %4274 = sst [smem:[#allocation14_spill]] %s3626_s27  ;;  %s47_s15 = sadd.s32 1, %s3610_s23 }
  0x15   : > { %4275 = sst [smem:[#allocation15_spill]] %s3630_s28  ;;  %p54_p1 = scmp.ne.s32.totalorder %s3610_s23, %s3606_s22 }
  0x16   : > { %p55_p2 = scmp.eq.s32.totalorder %s3630_s28, 0  ;;  %s4315_s13 = smov (%p38_p0, %s37_s13), 0 }
  0x17   : > { %4276 = sst [smem:[#allocation16_spill]] %s4315_s13  ;;  %s4317_s14 = smov (!%p38_p0, %s40_s14), %s3626_s27 }
  0x18   : > { %p3763_p3 = por %p55_p2, %p54_p1  ;;  %p60_p4 = scmp.ne.s32.totalorder %s3606_s22, %s3602_s21 }
  0x19   : > { %p42_p5 = scmp.ge.s32.totalorder %s4317_s14, 2  ;;  %p61_p6 = scmp.eq.s32.totalorder %s3009_s29, 0 }
  0x1a   : > { %p370_p7 = scmp.eq.s32.totalorder %s3009_s29, 3  ;;  %p376_p8 = scmp.eq.s32.totalorder %s3010_s30, 3 }
  0x1b   : > { %s4319_s14 = smov (%p42_p5, %s4317_s14), 0  ;;  %p3771_p9 = por %p61_p6, %p60_p4 }
  0x1c   : > { %4278 = sst [smem:[#allocation17_spill]] %s4319_s14  ;;  %p3775_p10 = por %p370_p7, %p54_p1 }
  0x1d   : > { %s44_s19 = ssub.s32 %s3626_s27, %s4319_s14  ;;  %p3781_p11 = por %p376_p8, %p60_p4 }
  0x1e   : > { %s4280_s18 = scalar_select %p3775_p10, 1, 0 }
  0x1f   : > { %s4282_s20 = scalar_select %p3781_p11, 1, 0 }
  0x20   : > { %4281 = sst [smem:[#allocation18_spill]] %s4280_s18  ;;  %p45_p12 = scmp.eq.s32.totalorder %s44_s19, 0 }
  0x21   : > { %4283 = sst [smem:[#allocation19_spill]] %s4282_s20  ;;  %p3405_p13 = scmp.lt.s32.totalorder %s3630_s28, 4 }
  0x22   : > { %s396_s29 = sand.u32 1, %s3610_s23   ;;  %s3014_s26 = sshll.u32 %s3626_s27, 7 }
  0x23   : > { %s3788_s30 = scalar_select %p45_p12, %s3610_s23, %s47_s15  }
  0x24   : > { %s3013_s13 = sshll.u32 %s396_s29, 3  ;;  %s4285_s0 = sld [smem:[#allocation22_spill]] }
  0x25   : > { %4284 = sst [smem:[#allocation20_spill]] %s3788_s30  ;;  %s400_s10 = scalar_lea.vmem [#allocation3], %s3013_s13 }
  0x26   : > { %s407_s11 = sshll.u32 %s400_s10, 4  ;;  %p3796_p0 = pnand %p3405_p13, %p3763_p3  ;;  %s408_s11 = int_to_ptr.vmem [resolvable:$true] %s407_s11 }
  0x27   : > { %p3015_p1 = scmp.ge.s32.totalorder %s3630_s28, 1  ;;  %p486_p2 = scmp.lt.s32.totalorder %s3630_s28, 5 }
  0x28   : > { %s397_s19 = scalar_lea.sflag [#allocation4], %s396_s29  ;;  %p3508_p4 = pneg %p3796_p0 }
  0x29   : > { %s3519_s15 = scalar_lea.vmem %s408_s11, 128  ;;  %s3632_s12 = smov [#allocation3]  }
  0x2a   : > { %s405_s25 = scalar_lea.hbm %s4285_s0, %s3014_s26  ;;  %p3520_p5 = scmp.ne.s32.totalorder %s408_s11, %s3519_s15 }
  0x2b   : > { %s3524_s21 = sshll.u32 %s3632_s12, 4  ;;  %s3525_s21 = int_to_ptr.vmem [resolvable:$false] %s3524_s21 }
  0x2c   : > { %p3522_p6 = pnand %p3520_p5, %p3508_p4  ;;  %s3526_s10 = scalar_lea.vmem %s3525_s21, 256 }
  0x2d   : > { %p3527_p8 = scmp.lt.s32.totalorder %s408_s11, %s3525_s21  ;;  %p3528_p12 = scmp.lt.s32.totalorder %s3526_s10, %s3519_s15 }
  0x2e   : > { %p3523_p7 = pneg %p3522_p6 }
  0x2f   : > { %p3529_p3 = por %p3528_p12, %p3527_p8 }
  0x31   : > { %p3530_p13 = pnand %p3529_p3, %p3523_p7 }
  0x33   : > { %3533 = shalt.err (!%p3530_p13)
}
  0x34   : > { %3400 = dma.hbm_to_vmem [thread:$0]  (!%p3796_p0), %s405_s25, 128, %s408_s11, %s397_s19  }
  0x35   : > { %p487_p11 = pnand %p3015_p1, %p486_p2 }
  0x37   : > { %490 = sbr.rel (%p487_p11) target bundleno = 4745 (0x1289), region = 68 }
  0x3c   : > { %s3811_s26 = sand.u32 1, %s3606_s22  }
  0x3d   : > { %4287 = sst [smem:[#allocation21_spill]] %s3811_s26  ;;  %s3016_s13 = sshll.u32 %s3811_s26, 3 }
  0x3e   : > { %s493_s16 = scalar_lea.sflag [#allocation4], %s3811_s26  ;;  %s496_s29 = scalar_lea.vmem [#allocation3], %s3016_s13 }
  0x3f   : > { %3593 = dma.done.wait (%p3771_p9), %s493_s16, 128  }
  0x40   : > { %3595 = vsyncadd (%p3771_p9), %s493_s16, 4294967168  ;;  %p578_p0 = scmp.lt.s32.totalorder %s3614_s24, 1  ;;  %s4288_s3 = sld [smem:[#allocation23_spill]] }
  0x41   : > { %s4289_s4 = sld [smem:[#allocation24_spill]]  ;;  %s3873_s12 = scalar_lea.vmem [#allocation6], %s3016_s13 }
  0x42   : > { %s3821_s11 = scalar_select %p578_p0, %s3614_s24, 1 }
  0x43   : > { %s4291_s18 = sld [smem:[#allocation27_spill]]  ;;  %p3026_p9 = scmp.ne.s32.totalorder %s3614_s24, 0 }
  0x44   : > { %s3069_s21 = sshll.u32 %s3821_s11, 5  ;;  %s602_s28 = scalar_lea.vmem %s4243_s7, %s3821_s11 }
  0x45   : > { %s3857_s0 = scalar_lea.vmem %s4244_s8, %s3069_s21  ;;  %s3072_s23 = sshll.u32 %s3821_s11, 6 }
  0x46   : > { %s3839_s14 = scalar_lea.vmem %s4288_s3, %s3069_s21  ;;  %s610_s3 = scalar_lea.vmem %s4245_s9, %s3821_s11 }
  0x47   : > { %s3844_s22 = scalar_lea.vmem %s4289_s4, %s3069_s21  ;;  %s4292_s17 = sld [smem:[#allocation26_spill]] }
  0x49   : > { %s618_s26 = scalar_lea.vmem %s4291_s18, %s3821_s11  ;;  %622 = sbr.rel (%p3026_p9) target bundleno = 80 (0x50), region = 76 }
  0x4d   : > { %s3871_s6 = scalar_lea.vmem %s4292_s17, %s3072_s23 }
  0x4e   : > { %v623_v0 = vld [vmem:[%s496_s29] sm:$0xff]  ;;  %vm624_vm0 = vcmask 261120  }
  0x4f   : > { %625 = vst.msk [vmem:[#allocation2] sm:$0xff] %vm624_vm0, %v623_v0 }
  0x50 PF: > { %vm629_vm1 = vcmask 261120   ;;  %v3881_v3 = vld [vmem:[%s3839_s14 + $0x18] sm:$0xff]  ;;  %s3633_s4 = smov 96   ;;  %v3885_v4 = vld [vmem:[%s3839_s14 + $0x10] sm:$0xff]  ;;  %v3889_v5 = vld [vmem:[%s3839_s14] sm:$0xff]  ;;  %s3634_s18 = smov 64  }
  0x51   : > { %749 = vrot.lane.b32.xlu1 %v3881_v3, %s3633_s4  ;;  %v3895_v6 = vld [vmem:[%s3839_s14 + $0x8] sm:$0xff]  ;;  %v3635_v13 = vmov 0.0   ;;  %vm3636_vm2 = vmmov 0   ;;  %s4293_s21 = scalar_lea.vmem %s4237_s1, %s3821_s11  ;;  %s4294_s15 = scalar_lea.vmem %s4238_s2, %s3821_s11  ;;  %vm907_vm3 = vcmask 64512   ;;  %vm2722_vm4 = vcmask 523264  }
  0x52   : > { %3182 = vmatprep.subr.mxu1 %v3635_v13  ;;  %3171 = vmatprep.subr.mxu0 %v3635_v13  ;;  %v3027_v23 = vld [vmem:[%s4293_s21] ss:$0 sm:$0xff]  ;;  %s3637_s10 = smov 88   ;;  %s3638_s16 = smov 120  }
  0x53   : > { %3172 = vmatpush3.msra.mxu0 %v3881_v3  ;;  %3179 = vmatprep.mubr.msk.f32.mxu0 %vm3636_vm2, %v3635_v13  ;;  %v3028_v25 = vld [vmem:[%s4294_s15] ss:$0 sm:$0xff]  ;;  %s3639_s27 = smov 56   ;;  %s3640_s25 = smov 80  }
  0x54   : > { %3173 = vmatprep.subr.mxu0 %v3635_v13  ;;  %3190 = vmatprep.mubr.msk.f32.mxu1 %vm3636_vm2, %v3635_v13  ;;  %s3641_s23 = smov 112   ;;  %s3642_s30 = smov 48  }
  0x55   : > { %747 = vrot.lane.b32.xlu1 %v3885_v4, %s3633_s4  ;;  %3174 = vmatpush3.msra.mxu0 %v3885_v4  ;;  %s3643_s20 = smov 72   ;;  %s3644_s19 = smov 104  }
  0x56   : > { %v3876_v1 = vld [vmem:[#allocation2] sm:$0xff]  ;;  %3175 = vmatprep.subr.mxu0 %v3635_v13  ;;  %s4295_s13 = scalar_lea.vmem %s4241_s5, %s3821_s11  ;;  %s4296_s14 = sld [smem:[#allocation25_spill]] }
  0x57   : > { %v630_v2 = vsel %vm629_vm1, %v3876_v1, 0.0  ;;  %3176 = vmatpush3.msra.mxu0 %v3895_v6  ;;  %p3064_p11 = scmp.ne.s32.totalorder %s3614_s24, 1 }
  0x58   : > { %631 = vadd.xlane.f32.xlu0 %v630_v2  ;;  %3177 = vmatprep.subr.mxu0 %v3635_v13 }
  0x59   : > { %743 = vrot.lane.b32.xlu1 %v3889_v5, %s3633_s4  ;;  %3178 = vmatpush3.msra.mxu0 %v3889_v5 }
  0x5a   : > { %3193 = vmatprep.subr.mxu0 %v3635_v13 }
  0x5c   : > { %s4297_s17 = scalar_lea.vmem %s4296_s14, %s3821_s11 }
  0x5d   : > { %831 = vrot.lane.b32.xlu1 %v3881_v3, %s3634_s18 }
  0x61   : > { %829 = vrot.lane.b32.xlu1 %v3885_v4, %s3634_s18 }
  0x65   : > { %827 = vrot.lane.b32.xlu1 %v3895_v6, %s3634_s18 }
  0x69   : > { %825 = vrot.lane.b32.xlu1 %v3889_v5, %s3634_s18 }
  0xc3   : > { %v750_v12 = vpop.permute.xlu1 %749 }
  0xc4   : > { %3183 = vmatpush3.msra.mxu1 %v750_v12 }
  0xc5   : > { %3184 = vmatprep.subr.mxu1 %v3635_v13 }
  0xc7   : > { %v748_v14 = vpop.permute.xlu1 %747 }
  0xc8   : > { %3185 = vmatpush3.msra.mxu1 %v748_v14 }
  0xc9   : > { %3186 = vmatprep.subr.mxu1 %v3635_v13 }
  0xcb   : > { %v744_v19 = vpop.permute.xlu1 %743 }
  0xcf   : > { %v832_v20 = vpop.permute.xlu1 %831 }
  0xd3   : > { %v830_v21 = vpop.permute.xlu1 %829 }
  0xd7   : > { %v828_v28 = vpop.permute.xlu1 %827 }
  0xdb   : > { %v826_v29 = vpop.permute.xlu1 %825 }
  0xe1   : > { %v632_v7 = vpop.xlane.xlu0 %631 }
  0xe2   : > { %v634_v8 = vmul.f32 0.03125, %v632_v7 }
  0xe4   : > { %v635_v9 = vsub.f32 %v3876_v1, %v634_v8 }
  0xe6   : > { %v636_v10 = vmul.f32 %v635_v9, %v635_v9 }
  0xe8   : > { %v637_v11 = vsel %vm629_vm1, %v636_v10, 0.0 }
  0xe9   : > { %638 = vadd.xlane.f32.xlu0 %v637_v11 }
  0xff   : > { %745 = vrot.lane.b32.xlu0 %v3895_v6, %s3633_s4  ;;  %s3645_s4 = smov 40  }
 0x103   : > { %1156 = vrot.lane.b32.xlu0 %v3881_v3, %s3637_s10 }
 0x172   : > { %v639_v15 = vpop.xlane.xlu0 %638 }
 0x173   : > { %v640_v16 = vmul.f32 0.03125, %v639_v15 }
 0x175   : > { %v641_v17 = vadd.f32 1e-05, %v640_v16 }
 0x176   : > { %v746_v18 = vpop.permute.xlu0 %745 }
 0x177   : > { %3484 = vrsqrt.f32 %v641_v17  ;;  %3187 = vmatpush3.msra.mxu1 %v746_v18  ;;  %v663_v17 = vld [vmem:[%s3844_s22 + $0x8] sm:$0xff] }
 0x178   : > { %3188 = vmatprep.subr.mxu1 %v3635_v13 }
 0x179   : > { %3189 = vmatpush3.msra.mxu1 %v744_v19 }
 0x17a   : > { %3209 = vmatprep.subr.mxu1 %v3635_v13  ;;  %v1157_v48 = vpop.permute.xlu0 %1156 }
 0x184   : > { %v3485_v22 = vpop.eup %3484 }
 0x185   : > { %v643_v24 = vmul.f32 %v3485_v22, %v635_v9  ;;  %v662_v22 = vld [vmem:[%s3844_s22] sm:$0xff] }
 0x187   : > { %v650_v26 = vmul.f32 %v3027_v23, %v643_v24 }
 0x189   : > { %v3930_v27 = vadd.f32 %v3028_v25, %v650_v26 }
 0x18b   : > { %3180 = vmatmul.mubr.msk.f32.vlgmr.msra.gmra.mxu0 %vm629_vm1, %v3930_v27  ;;  %3191 = vmatmul.mubr.msk.f32.vlgmr.msra.gmra.mxu1 %vm629_vm1, %v3930_v27 }
 0x18c   : > { %3194 = vmatpush3.msra.mxu0 %v832_v20  ;;  %3201 = vmatprep.mubr.msk.f32.mxu0 %vm3636_vm2, %v3635_v13 }
 0x18d   : > { %3195 = vmatprep.subr.mxu0 %v3635_v13  ;;  %3211 = vmatprep.mubr.msk.f32.mxu1 %vm3636_vm2, %v3635_v13 }
 0x18e   : > { %3196 = vmatpush3.msra.mxu0 %v830_v21 }
 0x18f   : > { %3197 = vmatprep.subr.mxu0 %v3635_v13 }
 0x190   : > { %3198 = vmatpush3.msra.mxu0 %v828_v28 }
 0x191   : > { %3199 = vmatprep.subr.mxu0 %v3635_v13 }
 0x192   : > { %3200 = vmatpush3.msra.mxu0 %v826_v29 }
 0x193   : > { %3202 = vmatmul.mubr.msk.f32.vlgmr.msra.gmra.mxu0 %vm629_vm1, %v3930_v27  ;;  %3204 = vmatprep.subr.mxu0 %v3635_v13 }
 0x194   : > { %3206 = vmatprep.mubr.msk.f32.mxu0 %vm3636_vm2, %v3635_v13 }
 0x24b   : > { %v735_v30 = vpop.f32.mrf.mxu0  ;;  %v821_v31 = vpop.f32.mrf.mxu1 }
 0x24c   : > { %3205 = vmatpush3.xpose.msk.msra.mxu0 %vm907_vm3, %v821_v31 }
 0x24d   : > { %v3181_v32 = vpop.f32.mrf.mxu0  ;;  %v3192_v33 = vpop.f32.mrf.mxu1  ;;  %3214 = vmatprep.subr.mxu0 %v3635_v13 }
 0x24f   : > { %3207 = vmatmul.mubr.msk.f32.vlgmr.msra.gmra.mxu0 %vm907_vm3, %v735_v30 }
 0x250   : > { %3222 = vmatprep.mubr.msk.f32.mxu0 %vm3636_vm2, %v3635_v13 }
 0x253   : > { %v903_v34 = vpop.f32.mrf.mxu0 }
 0x254   : > { %3210 = vmatpush3.msra.mxu1 %v903_v34 }
 0x255   : > { %v3203_v35 = vpop.f32.mrf.mxu0  ;;  %3225 = vmatprep.subr.mxu1 %v3635_v13 }
 0x30f   : > { %v980_v36 = vpop.f32.mrf.mxu0 }
 0x310   : > { %v984_v37 = vsel %vm907_vm3, %v980_v36, -inf }
 0x311   : > { %985 = vmax.xlane.f32.xlu1 %v984_v37  ;;  %v3208_v38 = vpop.f32.mrf.mxu0 }
 0x322   : > { %1154 = vrot.lane.b32.xlu1 %v3885_v4, %s3637_s10 }
 0x326   : > { %1074 = vrot.lane.b32.xlu1 %v3881_v3, %s3638_s16 }
 0x32a   : > { %1072 = vrot.lane.b32.xlu1 %v3885_v4, %s3638_s16 }
 0x32e   : > { %1070 = vrot.lane.b32.xlu1 %v3895_v6, %s3638_s16 }
 0x332   : > { %1238 = vrot.lane.b32.xlu1 %v3881_v3, %s3639_s27 }
 0x336   : > { %1234 = vrot.lane.b32.xlu1 %v3895_v6, %s3639_s27 }
 0x39a   : > { %v986_v39 = vpop.xlane.xlu1 %985 }
 0x39b   : > { %v987_v40 = vsub.f32 %v980_v36, %v986_v39 }
 0x39d   : > { %v988_v41 = vmul.f32 1.442695, %v987_v40 }
 0x39e   : > { %v1155_v44 = vpop.permute.xlu1 %1154 }
 0x39f   : > { %3486 = vpow2.f32 %v988_v41 }
 0x3a2   : > { %v1075_v45 = vpop.permute.xlu1 %1074 }
 0x3a3   : > { %3215 = vmatpush3.msra.mxu0 %v1075_v45 }
 0x3a4   : > { %3216 = vmatprep.subr.mxu0 %v3635_v13 }
 0x3a6   : > { %v1073_v46 = vpop.permute.xlu1 %1072 }
 0x3a7   : > { %3217 = vmatpush3.msra.mxu0 %v1073_v46 }
 0x3a8   : > { %3218 = vmatprep.subr.mxu0 %v3635_v13 }
 0x3aa   : > { %v1071_v47 = vpop.permute.xlu1 %1070 }
 0x3ab   : > { %3219 = vmatpush3.msra.mxu0 %v1071_v47 }
 0x3ac   : > { %v3487_v42 = vpop.eup %3486  ;;  %3220 = vmatprep.subr.mxu0 %v3635_v13 }
 0x3ad   : > { %v990_v43 = vsel %vm907_vm3, %v3487_v42, 0.0 }
 0x3ae   : > { %991 = vadd.xlane.f32.xlu0 %v990_v43  ;;  %v1239_v52 = vpop.permute.xlu1 %1238 }
 0x3b2   : > { %v1235_v57 = vpop.permute.xlu1 %1234 }
 0x3c4   : > { %1152 = vrot.lane.b32.xlu0 %v3895_v6, %s3637_s10 }
 0x3c8   : > { %1150 = vrot.lane.b32.xlu0 %v3889_v5, %s3637_s10 }
 0x3cc   : > { %1068 = vrot.lane.b32.xlu0 %v3889_v5, %s3638_s16 }
 0x3d0   : > { %1236 = vrot.lane.b32.xlu0 %v3885_v4, %s3639_s27 }
 0x3d4   : > { %1232 = vrot.lane.b32.xlu0 %v3889_v5, %s3639_s27 }
 0x437   : > { %v992_v49 = vpop.xlane.xlu0 %991 }
 0x438   : > { %3488 = vrcp.f32 %v992_v49 }
 0x43b   : > { %v1153_v50 = vpop.permute.xlu0 %1152 }
 0x43f   : > { %v1151_v51 = vpop.permute.xlu0 %1150 }
 0x443   : > { %v1069_v53 = vpop.permute.xlu0 %1068 }
 0x444   : > { %3221 = vmatpush3.msra.mxu0 %v1069_v53 }
 0x445   : > { %v3489_v54 = vpop.eup %3488  ;;  %3223 = vmatmul.mubr.msk.f32.vlgmr.msra.gmra.mxu0 %vm629_vm1, %v3930_v27  ;;  %3236 = vmatprep.subr.mxu0 %v3635_v13 }
 0x446   : > { %3237 = vmatpush3.msra.mxu0 %v1239_v52  ;;  %v994_v55 = vmul.f32 %v3489_v54, %v3487_v42  ;;  %3244 = vmatprep.mubr.msk.f32.mxu0 %vm3636_vm2, %v3635_v13 }
 0x447   : > { %3238 = vmatprep.subr.mxu0 %v3635_v13  ;;  %v1237_v56 = vpop.permute.xlu0 %1236 }
 0x448   : > { %3212 = vmatmul.mubr.msk.f32.vlgmr.msra.gmra.mxu1 %vm907_vm3, %v994_v55  ;;  %3239 = vmatpush3.msra.mxu0 %v1237_v56  ;;  %v664_v55 = vld [vmem:[%s3844_s22 + $0x10] sm:$0xff] }
 0x449   : > { %3226 = vmatpush3.msra.mxu1 %v1157_v48  ;;  %3240 = vmatprep.subr.mxu0 %v3635_v13 }
 0x44a   : > { %3227 = vmatprep.subr.mxu1 %v3635_v13  ;;  %3241 = vmatpush3.msra.mxu0 %v1235_v57 }
 0x44b   : > { %3228 = vmatpush3.msra.mxu1 %v1155_v44  ;;  %3242 = vmatprep.subr.mxu0 %v3635_v13  ;;  %v1233_v58 = vpop.permute.xlu0 %1232 }
 0x44c   : > { %3229 = vmatprep.subr.mxu1 %v3635_v13  ;;  %3243 = vmatpush3.msra.mxu0 %v1233_v58 }
 0x44d   : > { %3230 = vmatpush3.msra.mxu1 %v1153_v50  ;;  %3245 = vmatmul.mubr.msk.f32.vlgmr.msra.gmra.mxu0 %vm629_vm1, %v3930_v27 }
 0x44e   : > { %3231 = vmatprep.subr.mxu1 %v3635_v13  ;;  %3233 = vmatprep.mubr.msk.f32.mxu1 %vm3636_vm2, %v3635_v13 }
 0x44f   : > { %3232 = vmatpush3.msra.mxu1 %v1151_v51  ;;  %3257 = vmatprep.subr.mxu0 %v3635_v13 }
 0x450   : > { %3234 = vmatmul.mubr.msk.f32.vlgmr.msra.gmra.mxu1 %vm629_vm1, %v3930_v27  ;;  %3247 = vmatprep.subr.mxu1 %v3635_v13 }
 0x451   : > { %3249 = vmatprep.mubr.msk.f32.mxu1 %vm3636_vm2, %v3635_v13  ;;  %3259 = vmatprep.mubr.msk.f32.mxu0 %vm3636_vm2, %v3635_v13 }
 0x452   : > { %3258 = vmatpush3.msra.mxu0 %v663_v17 }
 0x453   : > { %3267 = vmatprep.subr.mxu0 %v3635_v13 }
 0x505   : > { %v1146_v59 = vpop.f32.mrf.mxu0 }
 0x507   : > { %v3224_v60 = vpop.f32.mrf.mxu0 }
 0x508   : > { %v1064_v61 = vpop.f32.mrf.mxu1 }
 0x50a   : > { %v3213_v62 = vpop.f32.mrf.mxu1 }
 0x50d   : > { %v1310_v63 = vpop.f32.mrf.mxu0 }
 0x50f   : > { %v3246_v0 = vpop.f32.mrf.mxu0 }
 0x510   : > { %v1228_v2 = vpop.f32.mrf.mxu1 }
 0x511   : > { %3248 = vmatpush3.xpose.msk.msra.mxu1 %vm907_vm3, %v1228_v2 }
 0x512   : > { %v3235_v7 = vpop.f32.mrf.mxu1  ;;  %3252 = vmatprep.subr.mxu1 %v3635_v13 }
 0x514   : > { %3250 = vmatmul.mubr.msk.f32.vlgmr.msra.gmra.mxu1 %vm907_vm3, %v1146_v59 }
 0x515   : > { %3253 = vmatpush3.msra.mxu1 %v1310_v63  ;;  %3254 = vmatprep.mubr.msk.f32.mxu1 %vm3636_vm2, %v3635_v13 }
 0x516   : > { %3262 = vmatprep.subr.mxu1 %v3635_v13 }
 0x5d4   : > { %v1386_v8 = vpop.f32.mrf.mxu1 }
 0x5d5   : > { %v1390_v9 = vsel %vm907_vm3, %v1386_v8, -inf }
 0x5d6   : > { %1391 = vmax.xlane.f32.xlu1 %v1390_v9  ;;  %v3251_v10 = vpop.f32.mrf.mxu1 }
 0x5e7   : > { %1706 = vrot.lane.b32.xlu1 %v3885_v4, %s3640_s25 }
 0x5eb   : > { %1626 = vrot.lane.b32.xlu1 %v3881_v3, %s3641_s23 }
 0x5ef   : > { %1624 = vrot.lane.b32.xlu1 %v3885_v4, %s3641_s23 }
 0x5f3   : > { %1622 = vrot.lane.b32.xlu1 %v3895_v6, %s3641_s23 }
 0x5f7   : > { %1790 = vrot.lane.b32.xlu1 %v3881_v3, %s3642_s30 }
 0x5fb   : > { %1786 = vrot.lane.b32.xlu1 %v3895_v6, %s3642_s30 }
 0x65f   : > { %v1392_v11 = vpop.xlane.xlu1 %1391 }
 0x660   : > { %v1393_v12 = vsub.f32 %v1386_v8, %v1392_v11 }
 0x662   : > { %v1394_v14 = vmul.f32 1.442695, %v1393_v12 }
 0x663   : > { %v1707_v24 = vpop.permute.xlu1 %1706 }
 0x664   : > { %3490 = vpow2.f32 %v1394_v14 }
 0x667   : > { %v1627_v26 = vpop.permute.xlu1 %1626 }
 0x66b   : > { %v1625_v28 = vpop.permute.xlu1 %1624 }
 0x66f   : > { %v1623_v29 = vpop.permute.xlu1 %1622 }
 0x671   : > { %v3491_v15 = vpop.eup %3490 }
 0x672   : > { %v1396_v16 = vsel %vm907_vm3, %v3491_v15, 0.0 }
 0x673   : > { %1397 = vadd.xlane.f32.xlu0 %v1396_v16  ;;  %v1791_v34 = vpop.permute.xlu1 %1790 }
 0x677   : > { %v1787_v37 = vpop.permute.xlu1 %1786 }
 0x689   : > { %1708 = vrot.lane.b32.xlu0 %v3881_v3, %s3640_s25 }
 0x68d   : > { %1704 = vrot.lane.b32.xlu0 %v3895_v6, %s3640_s25 }
 0x691   : > { %1702 = vrot.lane.b32.xlu0 %v3889_v5, %s3640_s25 }
 0x695   : > { %1620 = vrot.lane.b32.xlu0 %v3889_v5, %s3641_s23 }
 0x699   : > { %1788 = vrot.lane.b32.xlu0 %v3885_v4, %s3642_s30 }
 0x69d   : > { %1784 = vrot.lane.b32.xlu0 %v3889_v5, %s3642_s30 }
 0x6fc   : > { %v1398_v18 = vpop.xlane.xlu0 %1397 }
 0x6fd   : > { %3492 = vrcp.f32 %v1398_v18 }
 0x700   : > { %v1709_v19 = vpop.permute.xlu0 %1708 }
 0x704   : > { %v1705_v23 = vpop.permute.xlu0 %1704 }
 0x708   : > { %v1703_v25 = vpop.permute.xlu0 %1702 }
 0x70a   : > { %v3493_v20 = vpop.eup %3492 }
 0x70b   : > { %v1400_v21 = vmul.f32 %v3493_v20, %v3491_v15 }
 0x70c   : > { %v1621_v31 = vpop.permute.xlu0 %1620 }
 0x70d   : > { %3255 = vmatmul.mubr.msk.f32.vlgmr.msra.gmra.mxu1 %vm907_vm3, %v1400_v21 }
 0x70e   : > { %3263 = vmatpush3.msra.mxu1 %v662_v22  ;;  %3264 = vmatprep.mubr.msk.f32.mxu1 %vm3636_vm2, %v3635_v13 }
 0x70f   : > { %3278 = vmatprep.subr.mxu1 %v3635_v13 }
 0x710   : > { %v1789_v36 = vpop.permute.xlu0 %1788 }
 0x711   : > { %3265 = vmatmul.mubr.msk.f32.vlgmr.msra.gmra.mxu1 %vm907_vm3, %v1064_v61 }
 0x712   : > { %3279 = vmatpush3.msra.mxu1 %v1709_v19  ;;  %3286 = vmatprep.mubr.msk.f32.mxu1 %vm3636_vm2, %v3635_v13 }
 0x713   : > { %3280 = vmatprep.subr.mxu1 %v3635_v13 }
 0x714   : > { %3281 = vmatpush3.msra.mxu1 %v1707_v24  ;;  %v1785_v39 = vpop.permute.xlu0 %1784 }
 0x715   : > { %3282 = vmatprep.subr.mxu1 %v3635_v13 }
 0x716   : > { %3283 = vmatpush3.msra.mxu1 %v1705_v23 }
 0x717   : > { %3284 = vmatprep.subr.mxu1 %v3635_v13 }
 0x718   : > { %3285 = vmatpush3.msra.mxu1 %v1703_v25 }
 0x719   : > { %3287 = vmatmul.mubr.msk.f32.vlgmr.msra.gmra.mxu1 %vm629_vm1, %v3930_v27  ;;  %3300 = vmatprep.subr.mxu1 %v3635_v13 }
 0x71a   : > { %3302 = vmatprep.mubr.msk.f32.mxu1 %vm3636_vm2, %v3635_v13 }
 0x7cd   : > { %v1470_v30 = vpop.f32.mrf.mxu1 }
 0x7ce   : > { %3260 = vmatmul.mubr.msk.f32.vlgmr.msra.gmra.mxu0 %vm907_vm3, %v1470_v30 }
 0x7cf   : > { %3268 = vmatpush3.msra.mxu0 %v1627_v26  ;;  %v3256_v32 = vpop.f32.mrf.mxu1  ;;  %3275 = vmatprep.mubr.msk.f32.mxu0 %vm3636_vm2, %v3635_v13 }
 0x7d0   : > { %3269 = vmatprep.subr.mxu0 %v3635_v13 }
 0x7d1   : > { %3270 = vmatpush3.msra.mxu0 %v1625_v28  ;;  %v4041_v33 = vpop.f32.mrf.mxu1 }
 0x7d2   : > { %3271 = vmatprep.subr.mxu0 %v3635_v13 }
 0x7d3   : > { %3272 = vmatpush3.msra.mxu0 %v1623_v29  ;;  %v3266_v35 = vpop.f32.mrf.mxu1  ;;  %v665_v29 = vld [vmem:[%s3844_s22 + $0x18] sm:$0xff] }
 0x7d4   : > { %3273 = vmatprep.subr.mxu0 %v3635_v13 }
 0x7d5   : > { %3274 = vmatpush3.msra.mxu0 %v1621_v31 }
 0x7d6   : > { %3276 = vmatmul.mubr.msk.f32.vlgmr.msra.gmra.mxu0 %vm629_vm1, %v3930_v27  ;;  %3289 = vmatprep.subr.mxu0 %v3635_v13 }
 0x7d7   : > { %3290 = vmatpush3.msra.mxu0 %v1791_v34  ;;  %3297 = vmatprep.mubr.msk.f32.mxu0 %vm3636_vm2, %v3635_v13 }
 0x7d8   : > { %3291 = vmatprep.subr.mxu0 %v3635_v13 }
 0x7d9   : > { %v1780_v38 = vpop.f32.mrf.mxu1  ;;  %3292 = vmatpush3.msra.mxu0 %v1789_v36 }
 0x7da   : > { %3293 = vmatprep.subr.mxu0 %v3635_v13  ;;  %3301 = vmatpush3.xpose.msk.msra.mxu1 %vm907_vm3, %v1780_v38 }
 0x7db   : > { %v3288_v40 = vpop.f32.mrf.mxu1  ;;  %3294 = vmatpush3.msra.mxu0 %v1787_v37  ;;  %3305 = vmatprep.subr.mxu1 %v3635_v13  ;;  %v3057_v37 = vld [vmem:[%s4295_s13] ss:$0 sm:$0xff] }
 0x7dc   : > { %3295 = vmatprep.subr.mxu0 %v3635_v13 }
 0x7dd   : > { %3296 = vmatpush3.msra.mxu0 %v1785_v39 }
 0x7de   : > { %3298 = vmatmul.mubr.msk.f32.vlgmr.msra.gmra.mxu0 %vm629_vm1, %v3930_v27  ;;  %3310 = vmatprep.subr.mxu0 %v3635_v13 }
 0x7df   : > { %3312 = vmatprep.mubr.msk.f32.mxu0 %vm3636_vm2, %v3635_v13  ;;  %3311 = vmatpush3.msra.mxu0 %v664_v55 }
 0x7e0   : > { %3326 = vmatprep.subr.mxu0 %v3635_v13 }
 0x88e   : > { %v4060_v41 = vpop.f32.mrf.mxu0 }
 0x88f   : > { %v1617_v15 = vadd.f32 %v4041_v33, %v4060_v41 }
 0x890   : > { %v3261_v42 = vpop.f32.mrf.mxu0 }
 0x896   : > { %v1698_v43 = vpop.f32.mrf.mxu0 }
 0x897   : > { %3303 = vmatmul.mubr.msk.f32.vlgmr.msra.gmra.mxu1 %vm907_vm3, %v1698_v43 }
 0x898   : > { %v3277_v44 = vpop.f32.mrf.mxu0  ;;  %3307 = vmatprep.mubr.msk.f32.mxu1 %vm3636_vm2, %v3635_v13 }
 0x89e   : > { %v1862_v45 = vpop.f32.mrf.mxu0 }
 0x89f   : > { %3306 = vmatpush3.msra.mxu1 %v1862_v45 }
 0x8a0   : > { %v3299_v46 = vpop.f32.mrf.mxu0  ;;  %3315 = vmatprep.subr.mxu1 %v3635_v13 }
 0x957   : > { %v1938_v47 = vpop.f32.mrf.mxu1 }
 0x958   : > { %v1942_v48 = vsel %vm907_vm3, %v1938_v47, -inf }
 0x959   : > { %1943 = vmax.xlane.f32.xlu1 %v1942_v48  ;;  %v3304_v49 = vpop.f32.mrf.mxu1  ;;  %v2619_v48 = vld [vmem:[%s3857_s0 + $0x8] sm:$0xff] }
 0x95a   : > { %v2618_v49 = vld [vmem:[%s3857_s0] sm:$0xff] }
 0x96a   : > { %2186 = vrot.lane.b32.xlu1 %v3885_v4, %s3643_s20 }
 0x96e   : > { %2106 = vrot.lane.b32.xlu1 %v3881_v3, %s3644_s19 }
 0x972   : > { %2104 = vrot.lane.b32.xlu1 %v3885_v4, %s3644_s19 }
 0x976   : > { %2102 = vrot.lane.b32.xlu1 %v3895_v6, %s3644_s19 }
 0x97a   : > { %2270 = vrot.lane.b32.xlu1 %v3881_v3, %s3645_s4 }
 0x97e   : > { %2266 = vrot.lane.b32.xlu1 %v3895_v6, %s3645_s4 }
 0x9e2   : > { %v1944_v50 = vpop.xlane.xlu1 %1943 }
 0x9e3   : > { %v1945_v51 = vsub.f32 %v1938_v47, %v1944_v50  ;;  %v2621_v47 = vld [vmem:[%s3857_s0 + $0x18] sm:$0xff] }
 0x9e5   : > { %v1946_v52 = vmul.f32 1.442695, %v1945_v51 }
 0x9e6   : > { %v2187_v56 = vpop.permute.xlu1 %2186 }
 0x9e7   : > { %3494 = vpow2.f32 %v1946_v52 }
 0x9ea   : > { %v2107_v58 = vpop.permute.xlu1 %2106 }
 0x9ee   : > { %v2105_v60 = vpop.permute.xlu1 %2104 }
 0x9f2   : > { %v2103_v63 = vpop.permute.xlu1 %2102 }
 0x9f4   : > { %v3495_v53 = vpop.eup %3494 }
 0x9f5   : > { %v1948_v54 = vsel %vm907_vm3, %v3495_v53, 0.0 }
 0x9f6   : > { %1949 = vadd.xlane.f32.xlu0 %v1948_v54  ;;  %v3058_v54 = vld [vmem:[%s4297_s17] ss:$0 sm:$0xff] }
 0xa0c   : > { %2188 = vrot.lane.b32.xlu0 %v3881_v3, %s3643_s20 }
 0xa10   : > { %2184 = vrot.lane.b32.xlu0 %v3895_v6, %s3643_s20 }
 0xa14   : > { %2182 = vrot.lane.b32.xlu0 %v3889_v5, %s3643_s20 }
 0xa18   : > { %2100 = vrot.lane.b32.xlu0 %v3889_v5, %s3644_s19 }
 0xa1c   : > { %2268 = vrot.lane.b32.xlu0 %v3885_v4, %s3645_s4 }
 0xa20   : > { %2264 = vrot.lane.b32.xlu0 %v3889_v5, %s3645_s4  ;;  %v2271_v5 = vpop.permute.xlu1 %2270 }
 0xa24   : > { %v2267_v2 = vpop.permute.xlu1 %2266 }
 0xa7f   : > { %v1950_v57 = vpop.xlane.xlu0 %1949 }
 0xa80   : > { %3496 = vrcp.f32 %v1950_v57 }
 0xa83   : > { %v2189_v59 = vpop.permute.xlu0 %2188 }
 0xa87   : > { %v2185_v3 = vpop.permute.xlu0 %2184 }
 0xa8b   : > { %v2183_v6 = vpop.permute.xlu0 %2182 }
 0xa8d   : > { %v3497_v61 = vpop.eup %3496 }
 0xa8e   : > { %v1952_v62 = vmul.f32 %v3497_v61, %v3495_v53  ;;  %v2710_v61 = vld [vmem:[%s3871_s6 + $0x18] sm:$0xff] }
 0xa8f   : > { %v2101_v4 = vpop.permute.xlu0 %2100 }
 0xa90   : > { %3308 = vmatmul.mubr.msk.f32.vlgmr.msra.gmra.mxu1 %vm907_vm3, %v1952_v62  ;;  %v2709_v62 = vld [vmem:[%s3871_s6 + $0x10] sm:$0xff] }
 0xa91   : > { %3316 = vmatpush3.msra.mxu1 %v2107_v58  ;;  %3323 = vmatprep.mubr.msk.f32.mxu1 %vm3636_vm2, %v3635_v13 }
 0xa92   : > { %3317 = vmatprep.subr.mxu1 %v3635_v13 }
 0xa93   : > { %3318 = vmatpush3.msra.mxu1 %v2105_v60  ;;  %v2269_v0 = vpop.permute.xlu0 %2268  ;;  %v2712_v60 = vld [vmem:[%s3871_s6 + $0x28] sm:$0xff] }
 0xa94   : > { %3319 = vmatprep.subr.mxu1 %v3635_v13 }
 0xa95   : > { %3320 = vmatpush3.msra.mxu1 %v2103_v63  ;;  %v2708_v63 = vld [vmem:[%s3871_s6 + $0x8] sm:$0xff] }
 0xa96   : > { %3321 = vmatprep.subr.mxu1 %v3635_v13 }
 0xa97   : > { %3322 = vmatpush3.msra.mxu1 %v2101_v4  ;;  %v2265_v7 = vpop.permute.xlu0 %2264  ;;  %v2707_v4 = vld [vmem:[%s3871_s6] sm:$0xff] }
 0xa98   : > { %3324 = vmatmul.mubr.msk.f32.vlgmr.msra.gmra.mxu1 %vm629_vm1, %v3930_v27  ;;  %3337 = vmatprep.subr.mxu1 %v3635_v13 }
 0xa99   : > { %3338 = vmatpush3.msra.mxu1 %v2271_v5  ;;  %3345 = vmatprep.mubr.msk.f32.mxu1 %vm3636_vm2, %v3635_v13  ;;  %v3060_v5 = vld [vmem:[%s610_s3] ss:$0 sm:$0xff] }
 0xa9a   : > { %3339 = vmatprep.subr.mxu1 %v3635_v13 }
 0xa9b   : > { %3340 = vmatpush3.msra.mxu1 %v2269_v0 }
 0xa9c   : > { %3341 = vmatprep.subr.mxu1 %v3635_v13 }
 0xa9d   : > { %3342 = vmatpush3.msra.mxu1 %v2267_v2 }
 0xa9e   : > { %3343 = vmatprep.subr.mxu1 %v3635_v13 }
 0xa9f   : > { %3344 = vmatpush3.msra.mxu1 %v2265_v7 }
 0xaa0   : > { %3346 = vmatmul.mubr.msk.f32.vlgmr.msra.gmra.mxu1 %vm629_vm1, %v3930_v27  ;;  %3358 = vmatprep.subr.mxu1 %v3635_v13 }
 0xaa1   : > { %3360 = vmatprep.mubr.msk.f32.mxu1 %vm3636_vm2, %v3635_v13  ;;  %3359 = vmatpush3.msra.mxu1 %v665_v29 }
 0xaa2   : > { %3374 = vmatprep.subr.mxu1 %v3635_v13 }
 0xb50   : > { %v2022_v8 = vpop.f32.mrf.mxu1 }
 0xb51   : > { %3313 = vmatmul.mubr.msk.f32.vlgmr.msra.gmra.mxu0 %vm907_vm3, %v2022_v8 }
 0xb52   : > { %3327 = vmatpush3.msra.mxu0 %v2189_v59  ;;  %v3309_v9 = vpop.f32.mrf.mxu1  ;;  %3334 = vmatprep.mubr.msk.f32.mxu0 %vm3636_vm2, %v3635_v13  ;;  %v2714_v59 = vld [vmem:[%s3871_s6 + $0x38] sm:$0xff] }
 0xb53   : > { %3328 = vmatprep.subr.mxu0 %v3635_v13 }
 0xb54   : > { %3329 = vmatpush3.msra.mxu0 %v2187_v56  ;;  %v3059_v56 = vld [vmem:[%s602_s28] ss:$0 sm:$0xff] }
 0xb55   : > { %3330 = vmatprep.subr.mxu0 %v3635_v13 }
 0xb56   : > { %3331 = vmatpush3.msra.mxu0 %v2185_v3  ;;  %v2713_v3 = vld [vmem:[%s3871_s6 + $0x30] sm:$0xff] }
 0xb57   : > { %3332 = vmatprep.subr.mxu0 %v3635_v13 }
 0xb58   : > { %v2178_v10 = vpop.f32.mrf.mxu1  ;;  %3333 = vmatpush3.msra.mxu0 %v2183_v6  ;;  %v2711_v6 = vld [vmem:[%s3871_s6 + $0x20] sm:$0xff] }
 0xb59   : > { %3335 = vmatmul.mubr.msk.f32.vlgmr.msra.gmra.mxu0 %vm629_vm1, %v3930_v27  ;;  %3348 = vmatprep.subr.mxu0 %v3635_v13 }
 0xb5a   : > { %v3325_v11 = vpop.f32.mrf.mxu1  ;;  %3350 = vmatprep.mubr.msk.f32.mxu0 %vm3636_vm2, %v3635_v13 }
 0xb60   : > { %v2342_v12 = vpop.f32.mrf.mxu1 }
 0xb62   : > { %v3347_v14 = vpop.f32.mrf.mxu1 }
 0xc11   : > { %v2095_v16 = vpop.f32.mrf.mxu0 }
 0xc12   : > { %v2099_v17 = vadd.f32 %v2095_v16, %v1617_v15 }
 0xc13   : > { %v3314_v18 = vpop.f32.mrf.mxu0 }
 0xc19   : > { %v2260_v19 = vpop.f32.mrf.mxu0 }
 0xc1a   : > { %3349 = vmatpush3.xpose.msk.msra.mxu0 %vm907_vm3, %v2260_v19 }
 0xc1b   : > { %v3336_v20 = vpop.f32.mrf.mxu0  ;;  %3353 = vmatprep.subr.mxu0 %v3635_v13 }
 0xc1d   : > { %3351 = vmatmul.mubr.msk.f32.vlgmr.msra.gmra.mxu0 %vm907_vm3, %v2178_v10 }
 0xc1e   : > { %3354 = vmatpush3.msra.mxu0 %v2342_v12  ;;  %3355 = vmatprep.mubr.msk.f32.mxu0 %vm3636_vm2, %v3635_v13 }
 0xc1f   : > { %3363 = vmatprep.subr.mxu0 %v3635_v13 }
 0xcdd   : > { %v2418_v27 = vpop.f32.mrf.mxu0 }
 0xcde   : > { %v2422_v21 = vsel %vm907_vm3, %v2418_v27, -inf }
 0xcdf   : > { %2423 = vmax.xlane.f32.xlu1 %v2422_v21  ;;  %v3352_v22 = vpop.f32.mrf.mxu0 }
 0xd68   : > { %v2424_v23 = vpop.xlane.xlu1 %2423 }
 0xd69   : > { %v2425_v24 = vsub.f32 %v2418_v27, %v2424_v23 }
 0xd6b   : > { %v2426_v25 = vmul.f32 1.442695, %v2425_v24 }
 0xd6d   : > { %3498 = vpow2.f32 %v2426_v25 }
 0xd7a   : > { %v3499_v26 = vpop.eup %3498 }
 0xd7b   : > { %v2428_v28 = vsel %vm907_vm3, %v3499_v26, 0.0 }
 0xd7c   : > { %2429 = vadd.xlane.f32.xlu0 %v2428_v28 }
 0xe05   : > { %v2430_v30 = vpop.xlane.xlu0 %2429 }
 0xe06   : > { %3500 = vrcp.f32 %v2430_v30 }
 0xe13   : > { %v3501_v31 = vpop.eup %3500 }
 0xe14   : > { %v2432_v32 = vmul.f32 %v3501_v31, %v3499_v26 }
 0xe16   : > { %3356 = vmatmul.mubr.msk.f32.vlgmr.msra.gmra.mxu0 %vm907_vm3, %v2432_v32 }
 0xe17   : > { %3371 = vmatprep.mubr.msk.f32.mxu0 %vm3636_vm2, %v3635_v13  ;;  %3364 = vmatpush3.msra.mxu0 %v2621_v47 }
 0xe18   : > { %3365 = vmatprep.subr.mxu0 %v3635_v13 }
 0xed6   : > { %v2502_v33 = vpop.f32.mrf.mxu0 }
 0xed7   : > { %3361 = vmatmul.mubr.msk.f32.vlgmr.msra.gmra.mxu1 %vm907_vm3, %v2502_v33 }
 0xed8   : > { %v3357_v34 = vpop.f32.mrf.mxu0  ;;  %3390 = vmatprep.mubr.msk.f32.mxu1 %vm3636_vm2, %v3635_v13  ;;  %3375 = vmatpush3.msra.mxu1 %v2714_v59 }
 0xed9   : > { %3376 = vmatprep.subr.mxu1 %v3635_v13 }
 0xeda   : > { %3377 = vmatpush3.msra.mxu1 %v2713_v3 }
 0xedb   : > { %3378 = vmatprep.subr.mxu1 %v3635_v13 }
 0xedc   : > { %3379 = vmatpush3.msra.mxu1 %v2712_v60 }
 0xedd   : > { %3380 = vmatprep.subr.mxu1 %v3635_v13 }
 0xede   : > { %3381 = vmatpush3.msra.mxu1 %v2711_v6 }
 0xedf   : > { %3382 = vmatprep.subr.mxu1 %v3635_v13 }
 0xee0   : > { %3383 = vmatpush3.msra.mxu1 %v2710_v61 }
 0xee1   : > { %3384 = vmatprep.subr.mxu1 %v3635_v13 }
 0xee2   : > { %3385 = vmatpush3.msra.mxu1 %v2709_v62 }
 0xee3   : > { %3386 = vmatprep.subr.mxu1 %v3635_v13 }
 0xee4   : > { %3387 = vmatpush3.msra.mxu1 %v2708_v63 }
 0xee5   : > { %3388 = vmatprep.subr.mxu1 %v3635_v13 }
 0xee6   : > { %3389 = vmatpush3.msra.mxu1 %v2707_v4 }
 0xf97   : > { %v2575_v35 = vpop.f32.mrf.mxu1 }
 0xf98   : > { %v2579_v36 = vadd.f32 %v2575_v35, %v2099_v17 }
 0xf99   : > { %v3362_v38 = vpop.f32.mrf.mxu1 }
 0xf9a   : > { %v2580_v39 = vadd.f32 %v2579_v36, %v3876_v1  ;;  %v2620_v1 = vld [vmem:[%s3857_s0 + $0x10] sm:$0xff] }
 0xf9b   : > { %3366 = vmatpush3.msra.mxu0 %v2620_v1 }
 0xf9c   : > { %v4136_v40 = vadd.f32 %v3057_v37, %v2580_v39  ;;  %3367 = vmatprep.subr.mxu0 %v3635_v13 }
 0xf9d   : > { %3368 = vmatpush3.msra.mxu0 %v2619_v48 }
 0xf9e   : > { %v2591_v41 = vsel %vm629_vm1, %v4136_v40, 0.0  ;;  %3369 = vmatprep.subr.mxu0 %v3635_v13  ;;  %v3062_v13 = vld [vmem:[%s618_s26] ss:$0 sm:$0xff] }
 0xf9f   : > { %2592 = vadd.xlane.f32.xlu0 %v2591_v41  ;;  %3370 = vmatpush3.msra.mxu0 %v2618_v49 }
0x1028   : > { %v2593_v42 = vpop.xlane.xlu0 %2592 }
0x1029   : > { %v2594_v43 = vmul.f32 0.03125, %v2593_v42 }
0x102b   : > { %v2595_v44 = vsub.f32 %v4136_v40, %v2594_v43 }
0x102d   : > { %v2596_v45 = vmul.f32 %v2595_v44, %v2595_v44 }
0x102f   : > { %v2597_v46 = vsel %vm629_vm1, %v2596_v45, 0.0 }
0x1030   : > { %2598 = vadd.xlane.f32.xlu1 %v2597_v46 }
0x10b9   : > { %v2599_v50 = vpop.xlane.xlu1 %2598 }
0x10ba   : > { %v2600_v51 = vmul.f32 0.03125, %v2599_v50 }
0x10bc   : > { %v2601_v52 = vadd.f32 1e-05, %v2600_v51 }
0x10be   : > { %3502 = vrsqrt.f32 %v2601_v52 }
0x10cb   : > { %v3503_v53 = vpop.eup %3502 }
0x10cc   : > { %v2603_v55 = vmul.f32 %v3503_v53, %v2595_v44 }
0x10ce   : > { %v2610_v57 = vmul.f32 %v3058_v54, %v2603_v55 }
0x10d0   : > { %v2617_v58 = vadd.f32 %v3059_v56, %v2610_v57 }
0x10d2   : > { %3372 = vmatmul.mubr.msk.f32.vlgmr.msra.gmra.mxu0 %vm629_vm1, %v2617_v58 }
0x1192   : > { %v2698_v0 = vpop.f32.mrf.mxu0 }
0x1193   : > { %v2699_v2 = vadd.f32 %v3060_v5, %v2698_v0 }
0x1194   : > { %v3373_v7 = vpop.f32.mrf.mxu0 }
0x1195   : > { %v2703_v8 = vmul.f32 0.70710677, %v2699_v2  ;;  %v2702_v10 = vmul.f32 0.5, %v2699_v2 }
0x1197   : > { %3504 = verf.f32 %v2703_v8 }
0x11a4   : > { %v3505_v9 = vpop.eup %3504 }
0x11a5   : > { %v2705_v11 = vadd.f32 1.0, %v3505_v9 }
0x11a7   : > { %v2706_v12 = vmul.f32 %v2705_v11, %v2702_v10 }
0x11a9   : > { %3391 = vmatmul.mubr.msk.f32.vlgmr.msra.gmra.mxu1 %vm2722_vm4, %v2706_v12 }
0x1269   : > { %v2792_v14 = vpop.f32.mrf.mxu1 }
0x126a   : > { %v2793_v15 = vadd.f32 %v3062_v13, %v2792_v14  ;;  %2801 = sbr.rel (%p3064_p11) target bundleno = 4720 (0x1270), region = 80 }
0x126b   : > { %v3392_v16 = vpop.f32.mrf.mxu1 }
0x126c   : > { %v2796_v17 = vadd.f32 %v2793_v15, %v4136_v40 }
0x126e   : > { %2797 = vst.msk [vmem:[#allocation2] sm:$0xff] %vm629_vm1, %v2796_v17 }
0x126f   : > { %2802 = vst.msk [vmem:[%s3873_s12] sm:$0xff] %vm629_vm1, %v2796_v17 }
0x1270 PF: > { %s4299_s3 = sld [smem:[#allocation12_spill]]  ;;  %s2817_s4 = sshll.u32 %s3873_s12, 4  ;;  %s2818_s4 = int_to_ptr.vmem [resolvable:$true] %s2817_s4 }
0x1271   : > { %s4300_s25 = sld [smem:[#allocation21_spill]]  ;;  %s3534_s18 = scalar_lea.vmem %s2818_s4, 128 }
0x1272   : > { %s4302_s20 = sld [smem:[#allocation28_spill]]  ;;  %p3535_p1 = scmp.ne.s32.totalorder %s2818_s4, %s3534_s18 }
0x1273   : > { %s3646_s24 = smov [#allocation6]  }
0x1274   : > { %p3536_p2 = pnand %p3535_p1, %p3775_p10  ;;  %s3538_s13 = sshll.u32 %s3646_s24, 4  ;;  %s3539_s13 = int_to_ptr.vmem [resolvable:$false] %s3538_s13 }
0x1275   : > { %s3540_s29 = scalar_lea.vmem %s3539_s13, 256  ;;  %p3541_p5 = scmp.lt.s32.totalorder %s2818_s4, %s3539_s13 }
0x1276   : > { %s3066_s11 = sshll.u32 %s4299_s3, 7  ;;  %p3537_p4 = pneg %p3536_p2 }
0x1277   : > { %s2804_s22 = scalar_lea.sflag [#allocation5], %s4300_s25  ;;  %p3542_p6 = scmp.lt.s32.totalorder %s3540_s29, %s3534_s18 }
0x1278   : > { %s2815_s19 = scalar_lea.hbm %s4302_s20, %s3066_s11 }
0x1279   : > { %p3543_p7 = por %p3542_p6, %p3541_p5 }
0x127b   : > { %p3544_p8 = pnand %p3543_p7, %p3537_p4 }
0x127d   : > { %3547 = shalt.err (!%p3544_p8)
}
0x127e   : > { %s3548_s21 = scalar_lea.hbm %s2815_s19, 128  ;;  %s3552_s17 = scalar_lea.hbm %s4302_s20, 256 }
0x127f   : > { %p3549_p12 = scmp.ne.s32.totalorder %s2815_s19, %s3548_s21  ;;  %p3553_p0 = scmp.lt.s32.totalorder %s2815_s19, %s4302_s20 }
0x1280   : > { %p3554_p9 = scmp.lt.s32.totalorder %s3552_s17, %s3548_s21 }
0x1281   : > { %p3550_p3 = pnand %p3549_p12, %p3775_p10 }
0x1282   : > { %p3555_p11 = por %p3554_p9, %p3553_p0 }
0x1283   : > { %p3551_p13 = pneg %p3550_p3 }
0x1285   : > { %p3556_p1 = pnand %p3555_p11, %p3551_p13 }
0x1287   : > { %3559 = shalt.err (!%p3556_p1)
}
0x1288   : > { %3395 = dma.vmem_to_hbm [thread:$0]  (%p3775_p10), %s2818_s4, 128, %s2815_s19, %s2804_s22  }
0x1289 PF: > { %s4303_s28 = sld [smem:[#allocation15_spill]] }
0x128a   : > { %s4304_s10 = sld [smem:[#allocation9_spill]] }
0x128b   : > { %s4305_s16 = sld [smem:[#allocation19_spill]] }
0x128f   : > { %p3406_p2 = scmp.ge.s32.totalorder %s4303_s28, 2 }
0x1290   : > { %s2829_s27 = sand.u32 1, %s4304_s10  }
0x1291   : > { %p4306_p4 = scmp.ne.s32.totalorder %s4305_s16, 0  ;;  %s2830_s6 = scalar_lea.sflag [#allocation5], %s2829_s27 }
0x1293   : > { %p3402_p5 = pnand %p3406_p2, %p4306_p4 }
0x1295   : > { %p3403_p6 = pneg %p3402_p5 }
0x1297   : > { %3597 = dma.done.wait (%p3403_p6), %s2830_s6, 128  }
0x1298   : > { %3599 = vsyncadd (%p3403_p6), %s2830_s6, 4294967168  ;;  %s28_s28 = sadd.s32 1, %s4303_s28   ;;  %s4307_s21 = sld [smem:[#allocation10_spill]] }
0x1299   : > { %p25_p7 = scmp.ge.s32.totalorder %s28_s28, 6   ;;  %s4308_s22 = sld [smem:[#allocation11_spill]] }
0x129a   : > { %s4309_s23 = sld [smem:[#allocation20_spill]] }
0x129b   : > { %s4310_s24 = sld [smem:[#allocation13_spill]]  ;;  %27 = sbr.rel (!%p25_p7) target bundleno = 15 (0xf), region = 154 }
0x129c   : > { %s4311_s25 = sld [smem:[#allocation14_spill]] }
0x129d   : > { %s4312_s26 = sld [smem:[#allocation16_spill]] }
0x129e   : > { %s4313_s27 = sld [smem:[#allocation17_spill]] }
0x12a0   :  { %2835 = vsyncpa [#allocation4], 1 }
0x12a1   :  { %2837 = vsyncpa [#allocation4 + $0x1], 1 }
0x12a2   :  { %2838 = vsyncpa [#allocation5], 1 }
0x12a3   :  { %2840 = vsyncpa [#allocation5 + $0x1], 1 }

</bundles_post_ra>
